<compile_context>
chip_gen: v7x
topology: tpu7x:2x2x1
jax: 0.10.0
libtpu: 0.0.40
codegen_flags: <defaults>
</compile_context>

<pallas_src>
import functools

import jax
import jax.numpy as jnp
from jax.experimental import pallas as pl
from jax.experimental.pallas import tpu as pltpu


def _round_up(n, m):
    return ((n + m - 1) // m) * m


# ---------------------------------------------------------------------------
# Kernel
# ---------------------------------------------------------------------------
def residual_block_kernel(x_ref, gamma_ref, beta_ref, w1_ref, b1_ref,
                          w2_ref, b2_ref, gate_ref, o_ref, *,
                          d_true, d_pad, neg_slope, eps):
    x = x_ref[...].astype(jnp.float32)                       # (TB, Dp)

    # --- LayerNorm(dim), eps = 1e-5 (PyTorch default); stats over true D only.
    # Padded lanes of x are zero, so sum(x) is already exact.  The padded
    # lanes contribute (Dp - D) * mean^2 to sum(diff^2); subtract it in
    # closed form instead of masking the whole tile (saves iota/cmp/select).
    inv_d = 1.0 / d_true
    mean = jnp.sum(x, axis=-1, keepdims=True) * inv_d
    diff = x - mean
    sq = jnp.sum(diff * diff, axis=-1, keepdims=True)
    if d_pad != d_true:                                       # static branch
        sq = sq - (d_pad - d_true) * (mean * mean)
    var = jnp.maximum(sq, 0.0) * inv_d
    xn = diff * jax.lax.rsqrt(var + eps)
    # Padded gamma/beta are zero -> padded lanes of xn become exactly zero.
    xn = xn * gamma_ref[...] + beta_ref[...]

    # --- Linear(dim -> inner_dim): bf16 operands, f32 accumulation on the MXU.
    h = jnp.dot(xn.astype(w1_ref.dtype), w1_ref[...],
                preferred_element_type=jnp.float32) + b1_ref[...]
    # --- LeakyReLU(negative_slope=0.1): single VALU max (slope in (0, 1)).
    h = jnp.maximum(h, neg_slope * h)
    # TODO(synk): nn.Dropout(p=0.15) is identity at inference; not implemented.

    # --- Linear(inner_dim -> dim)
    y = jnp.dot(h.astype(w2_ref.dtype), w2_ref[...],
                preferred_element_type=jnp.float32) + b2_ref[...]

    # --- residual with learnable scalar gate (scalar read from SMEM)
    o_ref[...] = (x + gate_ref[0, 0] * y).astype(o_ref.dtype)


# ---------------------------------------------------------------------------
# VMEM budgeting & tile selection
# ---------------------------------------------------------------------------
def _vmem_ceiling_bytes():
    cap = None
    try:
        info = pltpu.get_tpu_info()
        cap = getattr(info, "vmem_capacity_bytes", None)
    except Exception:
        cap = None
    if not cap:
        # Conservative fallback: assume the smallest per-TC VMEM (v7x, 64 MiB).
        cap = 64 * 1024 * 1024
    # Leave ~25% headroom for Mosaic internal scratch / spills.
    return max(32 * 1024 * 1024, int(cap) * 3 // 4)


def _vmem_need_bytes(tb, dp, ip, io_itemsize, mm_itemsize, param_buf_factor):
    # Double-buffered streamed x / out tiles.
    stream = 2 * tb * dp * (2 * io_itemsize)
    # Resident params (weights in matmul dtype, vectors in f32).
    params = (2 * dp * ip * mm_itemsize + 4 * (3 * dp + ip)) * param_buf_factor
    # Live in-kernel intermediates: x/xn/y f32 + xn bf16 on (TB, Dp);
    # h f32 + bf16 on (TB, Ip).
    inter = tb * (dp * (4 + 4 + 4 + mm_itemsize) + ip * (4 + mm_itemsize))
    return stream + params + inter + (2 << 20)


def _pick_batch_tile(B, block_b, fits):
    base = _round_up(B, 8)
    cap = max(8, _round_up(min(block_b, base), 8))
    cands = {c for c in (1024, 768, 512, 384, 256, 192, 128, 96, 64, 32, 16, 8)
             if c <= cap}
    if base <= cap:
        cands.add(base)
    cands = sorted(cands)
    fitting = [c for c in cands if fits(c)] or [cands[0]]
    # Minimize dead padded rows; on ties prefer the larger tile (fewer steps).
    return min(fitting, key=lambda c: (_round_up(B, c) - B, -c))


# ---------------------------------------------------------------------------
# Wrapper
# ---------------------------------------------------------------------------
def residual_block(x, gamma, beta, w1, b1, w2, b2, gate, *,
                   block_b=1024, matmul_dtype=jnp.bfloat16,
                   eps=1e-5, neg_slope=0.1):
    B, D = x.shape
    Din, Dinner = w1.shape
    assert Din == D and w2.shape == (Dinner, D)

    # Lane-dense (multiple-of-128) feature sizes; batch tile multiple of 8.
    Dp = _round_up(D, 128)
    Ip = _round_up(Dinner, 128)

    ceiling = _vmem_ceiling_bytes()
    mm_bytes = jnp.dtype(matmul_dtype).itemsize
    io_bytes = x.dtype.itemsize

    def fits(tb):  # assumes single-buffered resident params
        return _vmem_need_bytes(tb, Dp, Ip, io_bytes, mm_bytes, 1) <= ceiling

    TB = _pick_batch_tile(B, block_b, fits)
    Bp = _round_up(B, TB)

    f32 = jnp.float32
    xp = jnp.pad(x, ((0, Bp - B), (0, Dp - D)))
    gammap = jnp.pad(gamma.astype(f32), (0, Dp - D)).reshape(1, Dp)
    betap = jnp.pad(beta.astype(f32), (0, Dp - D)).reshape(1, Dp)
    w1p = jnp.pad(w1, ((0, Dp - D), (0, Ip - Dinner))).astype(matmul_dtype)
    b1p = jnp.pad(b1.astype(f32), (0, Ip - Dinner)).reshape(1, Ip)
    w2p = jnp.pad(w2, ((0, Ip - Dinner), (0, Dp - D))).astype(matmul_dtype)
    b2p = jnp.pad(b2.astype(f32), (0, Dp - D)).reshape(1, Dp)
    gate2 = jnp.asarray(gate, f32).reshape(1, 1)

    # vmem_limit: conservative (double-buffered params) need, clamped to the
    # per-generation ceiling (~96 MiB on v5e/v6e, ~48 MiB on v7x).
    need2 = _vmem_need_bytes(TB, Dp, Ip, io_bytes, mm_bytes, 2)
    vmem_limit = int(min(max(need2, 32 * 1024 * 1024), ceiling))

    kernel = functools.partial(residual_block_kernel, d_true=D, d_pad=Dp,
                               neg_slope=neg_slope, eps=eps)

    def build(use_buffered):
        def resident(shape):
            if use_buffered:
                # Constant index_map -> the block never changes; single-buffer
                # it to halve the resident-parameter VMEM footprint.
                return pl.BlockSpec(shape, lambda i: (0,) * len(shape),
                                    pipeline_mode=pl.Buffered(1))
            return pl.BlockSpec(shape, lambda i: (0,) * len(shape))

        return pl.pallas_call(
            kernel,
            out_shape=jax.ShapeDtypeStruct((Bp, Dp), x.dtype),
            grid_spec=pltpu.PrefetchScalarGridSpec(
                num_scalar_prefetch=0,
                grid=(Bp // TB,),
                in_specs=[
                    pl.BlockSpec((TB, Dp), lambda i: (i, 0)),          # x (streamed)
                    resident((1, Dp)),                                 # gamma
                    resident((1, Dp)),                                 # beta
                    resident((Dp, Ip)),                                # W1
                    resident((1, Ip)),                                 # b1
                    resident((Ip, Dp)),                                # W2
                    resident((1, Dp)),                                 # b2
                    pl.BlockSpec(memory_space=pltpu.MemorySpace.SMEM), # gate scalar
                ],
                out_specs=pl.BlockSpec((TB, Dp), lambda i: (i, 0)),
            ),
            compiler_params=pltpu.CompilerParams(
                dimension_semantics=("parallel",),
                vmem_limit_bytes=vmem_limit,
            ),
        )

    args = (xp, gammap, betap, w1p, b1p, w2p, b2p, gate2)
    try:
        out_p = build(use_buffered=True)(*args)
    except Exception:
        # Fallback for JAX versions that reject pipeline_mode on top-level
        # pallas_call BlockSpecs: default double-buffering (vmem_limit already
        # budgets for it).
        out_p = build(use_buffered=False)(*args)

    return out_p[:B, :D]


# ---------------------------------------------------------------------------
# Reference & test harness
# ---------------------------------------------------------------------------
def residual_block_ref(x, gamma, beta, w1, b1, w2, b2, gate,
                       *, eps=1e-5, neg_slope=0.1):
    mean = jnp.mean(x, axis=-1, keepdims=True)
    var = jnp.mean((x - mean) ** 2, axis=-1, keepdims=True)
    xn = (x - mean) * jax.lax.rsqrt(var + eps) * gamma + beta
    h = xn @ w1 + b1
    h = jnp.where(h >= 0.0, h, neg_slope * h)
    y = h @ w2 + b2
    return x + gate * y


def _make_params(key, D, expansion):
    Dinner = D * expansion
    kw1, kb1, kw2, kb2 = jax.random.split(key, 4)
    gamma = jnp.ones((D,), jnp.float32)                       # LayerNorm weight
    beta = jnp.zeros((D,), jnp.float32)                       # LayerNorm bias
    w1 = jax.random.normal(kw1, (D, Dinner), jnp.float32) * 0.05   # Linear1 (in, out)
    b1 = jax.random.normal(kb1, (Dinner,), jnp.float32) * 0.01
    w2 = jax.random.normal(kw2, (Dinner, D), jnp.float32) * 0.05   # Linear2 (in, out)
    b2 = jax.random.normal(kb2, (D,), jnp.float32) * 0.01
    gate = jnp.array([1.0], jnp.float32)                      # nn.Parameter([1.0])
    return gamma, beta, w1, b1, w2, b2, gate


if __name__ == "__main__":
    key = jax.random.PRNGKey(0)
    k1, k2, k3, k4 = jax.random.split(key, 4)

    # Case 1: lane-dense features (D=128), batch tiled over a multi-step grid.
    B, D, expansion = 512, 128, 2
    params = _make_params(k1, D, expansion)
    x = jax.random.normal(k2, (B, D), dtype=jnp.float32)
    out = jax.block_until_ready(residual_block(x, *params, block_b=128))
    ref = residual_block_ref(x, *params[:-1], params[-1][0])
    assert out.shape == (B, D)
    assert jnp.allclose(out, ref, atol=3e-2, rtol=3e-2), "case1 mismatch vs ref"

    # Case 2: small, unaligned sizes (D=32, B=37) -> exercises the padding path
    # and the closed-form variance correction for padded lanes.
    B2, D2 = 37, 32
    params2 = _make_params(k3, D2, expansion)
    x2 = jax.random.normal(k4, (B2, D2), dtype=jnp.float32)
    out2 = jax.block_until_ready(residual_block(x2, *params2))
    ref2 = residual_block_ref(x2, *params2[:-1], params2[-1][0])
    assert out2.shape == (B2, D2)
    assert jnp.allclose(out2, ref2, atol=3e-2, rtol=3e-2), "case2 mismatch vs ref"

    print("KERNEL_OK")
</pallas_src>

<mosaic_0001>
module attributes {stable_mosaic.version = 11 : i64} {
  func.func @residual_block_kernel(%arg0: i32, %arg1: memref<128x128xf32, #tpu.memory_space<vmem>>, %arg2: memref<1x128xf32, #tpu.memory_space<vmem>>, %arg3: memref<1x128xf32, #tpu.memory_space<vmem>>, %arg4: memref<128x256xbf16, #tpu.memory_space<vmem>>, %arg5: memref<1x256xf32, #tpu.memory_space<vmem>>, %arg6: memref<256x128xbf16, #tpu.memory_space<vmem>>, %arg7: memref<1x128xf32, #tpu.memory_space<vmem>>, %arg8: memref<1x1xf32, #tpu.memory_space<smem>>, %arg9: memref<128x128xf32, #tpu.memory_space<vmem>>) attributes {dimension_semantics = [#tpu.dimension_semantics<parallel>], iteration_bounds = array<i64: 4>, scalar_prefetch = 0 : i64, scratch_operands = 0 : i64, tpu.core_type = #tpu.core_type<tc>, window_params = [{transform_indices = @transform_0, window_bounds = array<i64: 128, 128>}, {pipeline_mode = #tpu.pipeline_mode<synchronous>, transform_indices = @transform_1, window_bounds = array<i64: 1, 128>}, {pipeline_mode = #tpu.pipeline_mode<synchronous>, transform_indices = @transform_2, window_bounds = array<i64: 1, 128>}, {pipeline_mode = #tpu.pipeline_mode<synchronous>, transform_indices = @transform_3, window_bounds = array<i64: 128, 256>}, {pipeline_mode = #tpu.pipeline_mode<synchronous>, transform_indices = @transform_4, window_bounds = array<i64: 1, 256>}, {pipeline_mode = #tpu.pipeline_mode<synchronous>, transform_indices = @transform_5, window_bounds = array<i64: 256, 128>}, {pipeline_mode = #tpu.pipeline_mode<synchronous>, transform_indices = @transform_6, window_bounds = array<i64: 1, 128>}, {transform_indices = @transform_7, window_bounds = array<i64: 1, 1>}, {transform_indices = @transform_8, window_bounds = array<i64: 128, 128>}]} {
    %c0 = arith.constant 0 : index
    %c0_0 = arith.constant 0 : index
    %0 = vector.load %arg1[%c0, %c0_0] : memref<128x128xf32, #tpu.memory_space<vmem>>, vector<128x128xf32>
    %cst = arith.constant dense<0.000000e+00> : vector<128xf32>
    %1 = vector.multi_reduction <add>, %0, %cst [1] : vector<128x128xf32> to vector<128xf32>
    %2 = vector.shape_cast %1 : vector<128xf32> to vector<128x1xf32>
    %cst_1 = arith.constant 7.812500e-03 : f32
    %3 = vector.broadcast %cst_1 : f32 to vector<128x1xf32>
    %4 = arith.mulf %2, %3 : vector<128x1xf32>
    %5 = vector.broadcast %4 : vector<128x1xf32> to vector<128x128xf32>
    %6 = arith.subf %0, %5 : vector<128x128xf32>
    %7 = arith.mulf %6, %6 : vector<128x128xf32>
    %cst_2 = arith.constant dense<0.000000e+00> : vector<128xf32>
    %8 = vector.multi_reduction <add>, %7, %cst_2 [1] : vector<128x128xf32> to vector<128xf32>
    %9 = vector.shape_cast %8 : vector<128xf32> to vector<128x1xf32>
    %cst_3 = arith.constant 0.000000e+00 : f32
    %10 = vector.broadcast %cst_3 : f32 to vector<128x1xf32>
    %11 = arith.maximumf %9, %10 : vector<128x1xf32>
    %cst_4 = arith.constant 7.812500e-03 : f32
    %12 = vector.broadcast %cst_4 : f32 to vector<128x1xf32>
    %13 = arith.mulf %11, %12 : vector<128x1xf32>
    %cst_5 = arith.constant 9.99999974E-6 : f32
    %14 = vector.broadcast %cst_5 : f32 to vector<128x1xf32>
    %15 = arith.addf %13, %14 : vector<128x1xf32>
    %16 = math.rsqrt %15 : vector<128x1xf32>
    %17 = vector.broadcast %16 : vector<128x1xf32> to vector<128x128xf32>
    %18 = arith.mulf %6, %17 : vector<128x128xf32>
    %c0_6 = arith.constant 0 : index
    %c0_7 = arith.constant 0 : index
    %19 = vector.load %arg2[%c0_6, %c0_7] : memref<1x128xf32, #tpu.memory_space<vmem>>, vector<1x128xf32>
    %20 = vector.broadcast %19 : vector<1x128xf32> to vector<128x128xf32>
    %21 = arith.mulf %18, %20 : vector<128x128xf32>
    %c0_8 = arith.constant 0 : index
    %c0_9 = arith.constant 0 : index
    %22 = vector.load %arg3[%c0_8, %c0_9] : memref<1x128xf32, #tpu.memory_space<vmem>>, vector<1x128xf32>
    %23 = vector.broadcast %22 : vector<1x128xf32> to vector<128x128xf32>
    %24 = arith.addf %21, %23 : vector<128x128xf32>
    %25 = arith.truncf %24 : vector<128x128xf32> to vector<128x128xbf16>
    %c0_10 = arith.constant 0 : index
    %c0_11 = arith.constant 0 : index
    %26 = vector.load %arg4[%c0_10, %c0_11] : memref<128x256xbf16, #tpu.memory_space<vmem>>, vector<128x256xbf16>
    %cst_12 = arith.constant dense<0.000000e+00> : vector<128x256xf32>
    %27 = tpu.matmul %25, %26, %cst_12 {dimension_numbers = #tpu.dot_dimension_numbers<[1], [0], [0], [1], [0, 0, 1, 1], [], []>} : vector<128x128xbf16>, vector<128x256xbf16>, vector<128x256xf32> -> vector<128x256xf32>
    %c0_13 = arith.constant 0 : index
    %c0_14 = arith.constant 0 : index
    %28 = vector.load %arg5[%c0_13, %c0_14] : memref<1x256xf32, #tpu.memory_space<vmem>>, vector<1x256xf32>
    %29 = vector.broadcast %28 : vector<1x256xf32> to vector<128x256xf32>
    %30 = arith.addf %27, %29 : vector<128x256xf32>
    %cst_15 = arith.constant 1.000000e-01 : f32
    %31 = vector.broadcast %cst_15 : f32 to vector<128x256xf32>
    %32 = arith.mulf %31, %30 : vector<128x256xf32>
    %33 = arith.maximumf %30, %32 : vector<128x256xf32>
    %34 = arith.truncf %33 : vector<128x256xf32> to vector<128x256xbf16>
    %c0_16 = arith.constant 0 : index
    %c0_17 = arith.constant 0 : index
    %35 = vector.load %arg6[%c0_16, %c0_17] : memref<256x128xbf16, #tpu.memory_space<vmem>>, vector<256x128xbf16>
    %cst_18 = arith.constant dense<0.000000e+00> : vector<128x128xf32>
    %36 = tpu.matmul %34, %35, %cst_18 {dimension_numbers = #tpu.dot_dimension_numbers<[1], [0], [0], [1], [0, 0, 1, 1], [], []>} : vector<128x256xbf16>, vector<256x128xbf16>, vector<128x128xf32> -> vector<128x128xf32>
    %c0_19 = arith.constant 0 : index
    %c0_20 = arith.constant 0 : index
    %37 = vector.load %arg7[%c0_19, %c0_20] : memref<1x128xf32, #tpu.memory_space<vmem>>, vector<1x128xf32>
    %38 = vector.broadcast %37 : vector<1x128xf32> to vector<128x128xf32>
    %39 = arith.addf %36, %38 : vector<128x128xf32>
    %c0_21 = arith.constant 0 : index
    %c0_22 = arith.constant 0 : index
    %40 = memref.load %arg8[%c0_21, %c0_22] : memref<1x1xf32, #tpu.memory_space<smem>>
    %41 = vector.broadcast %40 : f32 to vector<128x128xf32>
    %42 = arith.mulf %41, %39 : vector<128x128xf32>
    %43 = arith.addf %0, %42 : vector<128x128xf32>
    %c0_23 = arith.constant 0 : index
    %c0_24 = arith.constant 0 : index
    %44 = vector.load %arg9[%c0_23, %c0_24] : memref<128x128xf32, #tpu.memory_space<vmem>>, vector<128x128xf32>
    tpu.vector_store %arg9[%c0_23, %c0_24], %43 {strides = array<i32>} : memref<128x128xf32, #tpu.memory_space<vmem>>, vector<128x128xf32>,
    return
  }
  func.func @transform_0(%arg0: i32) -> (i32, i32) {
    %c0_i32 = arith.constant 0 : i32
    %c0_i32_0 = arith.constant 0 : i32
    return %arg0, %c0_i32 : i32, i32
  }
  func.func @transform_1(%arg0: i32) -> (i32, i32) {
    %c0_i32 = arith.constant 0 : i32
    %c0_i32_0 = arith.constant 0 : i32
    %c0_i32_1 = arith.constant 0 : i32
    return %c0_i32, %c0_i32_0 : i32, i32
  }
  func.func @transform_2(%arg0: i32) -> (i32, i32) {
    %c0_i32 = arith.constant 0 : i32
    %c0_i32_0 = arith.constant 0 : i32
    %c0_i32_1 = arith.constant 0 : i32
    return %c0_i32, %c0_i32_0 : i32, i32
  }
  func.func @transform_3(%arg0: i32) -> (i32, i32) {
    %c0_i32 = arith.constant 0 : i32
    %c0_i32_0 = arith.constant 0 : i32
    %c0_i32_1 = arith.constant 0 : i32
    return %c0_i32, %c0_i32_0 : i32, i32
  }
  func.func @transform_4(%arg0: i32) -> (i32, i32) {
    %c0_i32 = arith.constant 0 : i32
    %c0_i32_0 = arith.constant 0 : i32
    %c0_i32_1 = arith.constant 0 : i32
    return %c0_i32, %c0_i32_0 : i32, i32
  }
  func.func @transform_5(%arg0: i32) -> (i32, i32) {
    %c0_i32 = arith.constant 0 : i32
    %c0_i32_0 = arith.constant 0 : i32
    %c0_i32_1 = arith.constant 0 : i32
    return %c0_i32, %c0_i32_0 : i32, i32
  }
  func.func @transform_6(%arg0: i32) -> (i32, i32) {
    %c0_i32 = arith.constant 0 : i32
    %c0_i32_0 = arith.constant 0 : i32
    %c0_i32_1 = arith.constant 0 : i32
    return %c0_i32, %c0_i32_0 : i32, i32
  }
  func.func @transform_7(%arg0: i32) -> (i32, i32) {
    %c0_i32 = arith.constant 0 : i32
    %c0_i32_0 = arith.constant 0 : i32
    %c0_i32_1 = arith.constant 0 : i32
    return %c0_i32, %c0_i32_0 : i32, i32
  }
  func.func @transform_8(%arg0: i32) -> (i32, i32) {
    %c0_i32 = arith.constant 0 : i32
    %c0_i32_0 = arith.constant 0 : i32
    return %arg0, %c0_i32 : i32, i32
  }
}

module attributes {stable_mosaic.version = 11 : i64} {
  func.func @residual_block_kernel(%arg0: i32, %arg1: memref<128x128xf32, #tpu.memory_space<vmem>>, %arg2: memref<1x128xf32, #tpu.memory_space<vmem>>, %arg3: memref<1x128xf32, #tpu.memory_space<vmem>>, %arg4: memref<128x256xbf16, #tpu.memory_space<vmem>>, %arg5: memref<1x256xf32, #tpu.memory_space<vmem>>, %arg6: memref<256x128xbf16, #tpu.memory_space<vmem>>, %arg7: memref<1x128xf32, #tpu.memory_space<vmem>>, %arg8: memref<1x1xf32, #tpu.memory_space<smem>>, %arg9: memref<128x128xf32, #tpu.memory_space<vmem>>) attributes {dimension_semantics = [#tpu.dimension_semantics<parallel>], iteration_bounds = array<i64: 4>, scalar_prefetch = 0 : i64, scratch_operands = 0 : i64, tpu.core_type = #tpu.core_type<tc>, window_params = [{transform_indices = @transform_0, window_bounds = array<i64: 128, 128>}, {pipeline_mode = #tpu.pipeline_mode<synchronous>, transform_indices = @transform_1, window_bounds = array<i64: 1, 128>}, {pipeline_mode = #tpu.pipeline_mode<synchronous>, transform_indices = @transform_2, window_bounds = array<i64: 1, 128>}, {pipeline_mode = #tpu.pipeline_mode<synchronous>, transform_indices = @transform_3, window_bounds = array<i64: 128, 256>}, {pipeline_mode = #tpu.pipeline_mode<synchronous>, transform_indices = @transform_4, window_bounds = array<i64: 1, 256>}, {pipeline_mode = #tpu.pipeline_mode<synchronous>, transform_indices = @transform_5, window_bounds = array<i64: 256, 128>}, {pipeline_mode = #tpu.pipeline_mode<synchronous>, transform_indices = @transform_6, window_bounds = array<i64: 1, 128>}, {transform_indices = @transform_7, window_bounds = array<i64: 1, 1>}, {transform_indices = @transform_8, window_bounds = array<i64: 128, 128>}]} {
    %c0 = arith.constant 0 : index
    %c0_0 = arith.constant 0 : index
    %0 = vector.load %arg1[%c0, %c0_0] : memref<128x128xf32, #tpu.memory_space<vmem>>, vector<128x128xf32>
    %cst = arith.constant dense<0.000000e+00> : vector<128xf32>
    %1 = vector.multi_reduction <add>, %0, %cst [1] : vector<128x128xf32> to vector<128xf32>
    %2 = vector.shape_cast %1 : vector<128xf32> to vector<128x1xf32>
    %cst_1 = arith.constant 7.812500e-03 : f32
    %3 = vector.broadcast %cst_1 : f32 to vector<128x1xf32>
    %4 = arith.mulf %2, %3 : vector<128x1xf32>
    %5 = vector.broadcast %4 : vector<128x1xf32> to vector<128x128xf32>
    %6 = arith.subf %0, %5 : vector<128x128xf32>
    %7 = arith.mulf %6, %6 : vector<128x128xf32>
    %cst_2 = arith.constant dense<0.000000e+00> : vector<128xf32>
    %8 = vector.multi_reduction <add>, %7, %cst_2 [1] : vector<128x128xf32> to vector<128xf32>
    %9 = vector.shape_cast %8 : vector<128xf32> to vector<128x1xf32>
    %cst_3 = arith.constant 0.000000e+00 : f32
    %10 = vector.broadcast %cst_3 : f32 to vector<128x1xf32>
    %11 = arith.maximumf %9, %10 : vector<128x1xf32>
    %cst_4 = arith.constant 7.812500e-03 : f32
    %12 = vector.broadcast %cst_4 : f32 to vector<128x1xf32>
    %13 = arith.mulf %11, %12 : vector<128x1xf32>
    %cst_5 = arith.constant 9.99999974E-6 : f32
    %14 = vector.broadcast %cst_5 : f32 to vector<128x1xf32>
    %15 = arith.addf %13, %14 : vector<128x1xf32>
    %16 = math.rsqrt %15 : vector<128x1xf32>
    %17 = vector.broadcast %16 : vector<128x1xf32> to vector<128x128xf32>
    %18 = arith.mulf %6, %17 : vector<128x128xf32>
    %c0_6 = arith.constant 0 : index
    %c0_7 = arith.constant 0 : index
    %19 = vector.load %arg2[%c0_6, %c0_7] : memref<1x128xf32, #tpu.memory_space<vmem>>, vector<1x128xf32>
    %20 = vector.broadcast %19 : vector<1x128xf32> to vector<128x128xf32>
    %21 = arith.mulf %18, %20 : vector<128x128xf32>
    %c0_8 = arith.constant 0 : index
    %c0_9 = arith.constant 0 : index
    %22 = vector.load %arg3[%c0_8, %c0_9] : memref<1x128xf32, #tpu.memory_space<vmem>>, vector<1x128xf32>
    %23 = vector.broadcast %22 : vector<1x128xf32> to vector<128x128xf32>
    %24 = arith.addf %21, %23 : vector<128x128xf32>
    %25 = arith.truncf %24 : vector<128x128xf32> to vector<128x128xbf16>
    %c0_10 = arith.constant 0 : index
    %c0_11 = arith.constant 0 : index
    %26 = vector.load %arg4[%c0_10, %c0_11] : memref<128x256xbf16, #tpu.memory_space<vmem>>, vector<128x256xbf16>
    %cst_12 = arith.constant dense<0.000000e+00> : vector<128x256xf32>
    %27 = tpu.matmul %25, %26, %cst_12 {dimension_numbers = #tpu.dot_dimension_numbers<[1], [0], [0], [1], [0, 0, 1, 1], [], []>} : vector<128x128xbf16>, vector<128x256xbf16>, vector<128x256xf32> -> vector<128x256xf32>
    %c0_13 = arith.constant 0 : index
    %c0_14 = arith.constant 0 : index
    %28 = vector.load %arg5[%c0_13, %c0_14] : memref<1x256xf32, #tpu.memory_space<vmem>>, vector<1x256xf32>
    %29 = vector.broadcast %28 : vector<1x256xf32> to vector<128x256xf32>
    %30 = arith.addf %27, %29 : vector<128x256xf32>
    %cst_15 = arith.constant 1.000000e-01 : f32
    %31 = vector.broadcast %cst_15 : f32 to vector<128x256xf32>
    %32 = arith.mulf %31, %30 : vector<128x256xf32>
    %33 = arith.maximumf %30, %32 : vector<128x256xf32>
    %34 = arith.truncf %33 : vector<128x256xf32> to vector<128x256xbf16>
    %c0_16 = arith.constant 0 : index
    %c0_17 = arith.constant 0 : index
    %35 = vector.load %arg6[%c0_16, %c0_17] : memref<256x128xbf16, #tpu.memory_space<vmem>>, vector<256x128xbf16>
    %cst_18 = arith.constant dense<0.000000e+00> : vector<128x128xf32>
    %36 = tpu.matmul %34, %35, %cst_18 {dimension_numbers = #tpu.dot_dimension_numbers<[1], [0], [0], [1], [0, 0, 1, 1], [], []>} : vector<128x256xbf16>, vector<256x128xbf16>, vector<128x128xf32> -> vector<128x128xf32>
    %c0_19 = arith.constant 0 : index
    %c0_20 = arith.constant 0 : index
    %37 = vector.load %arg7[%c0_19, %c0_20] : memref<1x128xf32, #tpu.memory_space<vmem>>, vector<1x128xf32>
    %38 = vector.broadcast %37 : vector<1x128xf32> to vector<128x128xf32>
    %39 = arith.addf %36, %38 : vector<128x128xf32>
    %c0_21 = arith.constant 0 : index
    %c0_22 = arith.constant 0 : index
    %40 = memref.load %arg8[%c0_21, %c0_22] : memref<1x1xf32, #tpu.memory_space<smem>>
    %41 = vector.broadcast %40 : f32 to vector<128x128xf32>
    %42 = arith.mulf %41, %39 : vector<128x128xf32>
    %43 = arith.addf %0, %42 : vector<128x128xf32>
    %c0_23 = arith.constant 0 : index
    %c0_24 = arith.constant 0 : index
    %44 = vector.load %arg9[%c0_23, %c0_24] : memref<128x128xf32, #tpu.memory_space<vmem>>, vector<128x128xf32>
    tpu.vector_store %arg9[%c0_23, %c0_24], %43 {strides = array<i32>} : memref<128x128xf32, #tpu.memory_space<vmem>>, vector<128x128xf32>,
    return
  }
  func.func @transform_0(%arg0: i32) -> (i32, i32) {
    %c0_i32 = arith.constant 0 : i32
    %c0_i32_0 = arith.constant 0 : i32
    return %arg0, %c0_i32 : i32, i32
  }
  func.func @transform_1(%arg0: i32) -> (i32, i32) {
    %c0_i32 = arith.constant 0 : i32
    %c0_i32_0 = arith.constant 0 : i32
    %c0_i32_1 = arith.constant 0 : i32
    return %c0_i32, %c0_i32_0 : i32, i32
  }
  func.func @transform_2(%arg0: i32) -> (i32, i32) {
    %c0_i32 = arith.constant 0 : i32
    %c0_i32_0 = arith.constant 0 : i32
    %c0_i32_1 = arith.constant 0 : i32
    return %c0_i32, %c0_i32_0 : i32, i32
  }
  func.func @transform_3(%arg0: i32) -> (i32, i32) {
    %c0_i32 = arith.constant 0 : i32
    %c0_i32_0 = arith.constant 0 : i32
    %c0_i32_1 = arith.constant 0 : i32
    return %c0_i32, %c0_i32_0 : i32, i32
  }
  func.func @transform_4(%arg0: i32) -> (i32, i32) {
    %c0_i32 = arith.constant 0 : i32
    %c0_i32_0 = arith.constant 0 : i32
    %c0_i32_1 = arith.constant 0 : i32
    return %c0_i32, %c0_i32_0 : i32, i32
  }
  func.func @transform_5(%arg0: i32) -> (i32, i32) {
    %c0_i32 = arith.constant 0 : i32
    %c0_i32_0 = arith.constant 0 : i32
    %c0_i32_1 = arith.constant 0 : i32
    return %c0_i32, %c0_i32_0 : i32, i32
  }
  func.func @transform_6(%arg0: i32) -> (i32, i32) {
    %c0_i32 = arith.constant 0 : i32
    %c0_i32_0 = arith.constant 0 : i32
    %c0_i32_1 = arith.constant 0 : i32
    return %c0_i32, %c0_i32_0 : i32, i32
  }
  func.func @transform_7(%arg0: i32) -> (i32, i32) {
    %c0_i32 = arith.constant 0 : i32
    %c0_i32_0 = arith.constant 0 : i32
    %c0_i32_1 = arith.constant 0 : i32
    return %c0_i32, %c0_i32_0 : i32, i32
  }
  func.func @transform_8(%arg0: i32) -> (i32, i32) {
    %c0_i32 = arith.constant 0 : i32
    %c0_i32_0 = arith.constant 0 : i32
    return %arg0, %c0_i32 : i32, i32
  }
}

</mosaic_0001>

<bundles_post_ra>
// kernel: tpu_custom_call.1
= control target key start
LH: loop header
LB: loop body
LE: loop exit
PB: predicated region body
PF: predicated region fallthrough
CT: control target
= control target key end

     0   :  { %s2330_s0 = inlined_call_operand.hbm [shape: f32[512,128], index: 0, kind: input, shape index: {}]   ;;  %s2331_s1 = inlined_call_operand.vmem [shape: f32[1,128], index: 1, kind: input, shape index: {}]   ;;  %s2332_s2 = inlined_call_operand.vmem [shape: f32[1,128], index: 2, kind: input, shape index: {}]   ;;  %s2333_s3 = inlined_call_operand.hbm [shape: bf16[128,256], index: 3, kind: input, shape index: {}]   ;;  %s2334_s4 = inlined_call_operand.vmem [shape: f32[1,256], index: 4, kind: input, shape index: {}]   ;;  %s2335_s5 = inlined_call_operand.hbm [shape: bf16[256,128], index: 5, kind: input, shape index: {}]   ;;  %s2336_s6 = inlined_call_operand.vmem [shape: f32[1,128], index: 6, kind: input, shape index: {}]   ;;  %s2337_s7 = inlined_call_operand.<no memory space> [shape: f32[1,1], index: 7, kind: input, shape index: {}]   ;;  %s2338_s8 = inlined_call_operand.hbm [shape: f32[512,128], index: 8, kind: output, shape index: {}]  }
   0x1   :  { %13 = sst [smem:[#allocation2]] %s2337_s7 }
   0x2   :  { %14 = vsyncpa [#allocation4], 0 }
   0x3   :  { %16 = vsyncpa [#allocation4 + $0x1], 0 }
   0x4   :  { %17 = vsyncpa [#allocation7], 0 }
   0x5   :  { %18 = vsyncpa [#allocation5], 0 }
   0x6   :  { %20 = vsyncpa [#allocation5 + $0x1], 0  ;;  %s1806_s29 = smov 0   ;;  %s1808_s30 = smov 0  }
   0x7   :  { %s1810_s9 = smov 0   ;;  %s1812_s10 = smov 0  }
   0x8 LB: > { %s1827_s7 = sadd.s32 4294967295, %s1745_s10   ;;  %s1308_s11 = sadd.s32 4294967294, %s1745_s10   ;;  %s1745_s10 = sphi %s1812_s10, %s2359_s10   ;;  %s1741_s9 = sphi %s1810_s9, %s2358_s9   ;;  %s1737_s30 = sphi %s1808_s30, %s2357_s30   ;;  %s1733_s29 = sphi %s1806_s29, %s2356_s29  }
   0x9   : > { %p46_p0 = scmp.ne.s32.totalorder %s1737_s30, %s1733_s29  ;;  %p2339_p1 = scmp.eq.s32.totalorder %s1827_s7, 0 }
   0xa   : > { %p223_p3 = scmp.eq.s32.totalorder %s1308_s11, 3  ;;  %p1309_p5 = scmp.ge.s32.totalorder %s1745_s10, 1 }
   0xb   : > { %p1836_p4 = por %p2339_p1, %p46_p0  ;;  %p230_p7 = scmp.lt.s32.totalorder %s1745_s10, 5 }
   0xc   : > { %p1841_p6 = por %p223_p3, %p46_p0  ;;  %s1747_s15 = smov [#allocation6]  }
   0xd   : > { %s2343_s12 = scalar_select %p1836_p4, 1, 0 }
   0xe   : > { %s2344_s13 = scalar_select %p1841_p6, 1, 0 }
   0xf   : > { %p1846_p8 = pnand %p1309_p5, %p230_p7  ;;  %s248_s16 = sshll.u32 %s1747_s15, 4  ;;  %s249_s16 = int_to_ptr.vmem [resolvable:$true] %s248_s16 }
  0x10   : > { %s1748_s18 = smov [#allocation8]   ;;  %s1589_s22 = scalar_lea.hbm %s2333_s3, 2048 }
  0x11   : > { %s2345_s14 = scalar_select %p1846_p8, 1, 0 }
  0x12   : > { %p1439_p9 = pneg %p1846_p8  ;;  %s264_s19 = sshll.u32 %s1748_s18, 4  ;;  %s1858_s19 = int_to_ptr.vmem [resolvable:$true] %s264_s19 }
  0x13   : > { %p1590_p11 = scmp.ne.s32.totalorder %s2333_s3, %s1589_s22  ;;  %p1596_p3 = scmp.lt.u32.totalorder %s1589_s22, %s2333_s3 }
  0x14   : > { %p1854_p10 = pnand %p1439_p9, %p2339_p1 }
  0x16   : > { %p1591_p12 = pneg %p1854_p10 }
  0x18   : > { %p1592_p13 = pnand %p1591_p12, %p1590_p11 }
  0x1a   : > { %p1593_p0 = pneg %p1592_p13 }
  0x1c   : > { %p1598_p5 = pnand %p1596_p3, %p1593_p0 }
  0x1e   : > { %1601 = shalt.err (!%p1598_p5)
}
  0x1f   : > { %s1602_s27 = scalar_lea.vmem %s249_s16, 2048  ;;  %p1610_p2 = scmp.lt.s32.totalorder %s249_s16, %s249_s16 }
  0x20   : > { %p1603_p7 = scmp.ne.s32.totalorder %s249_s16, %s1602_s27  ;;  %p1611_p6 = scmp.lt.s32.totalorder %s1602_s27, %s1602_s27 }
  0x22   : > { %p1605_p9 = pnand %p1603_p7, %p1591_p12  ;;  %p1612_p4 = por %p1611_p6, %p1610_p2 }
  0x24   : > { %p1606_p1 = pneg %p1605_p9 }
  0x26   : > { %p1613_p8 = pnand %p1612_p4, %p1606_p1 }
  0x28   : > { %1616 = shalt.err (!%p1613_p8)
}
  0x29   : > { %s2342_s28 = smov 128   ;;  %s1750_s11 = smov 8  }
  0x2a   : > { %1442 = dma.hbm_to_vmem [thread:$0]  (!%p1854_p10), %s2333_s3, 2048, %s249_s16, [#allocation7], %s2342_s28, %s2342_s28, %s1750_s11  }
  0x2b   : > { %s1617_s22 = scalar_lea.hbm %s2335_s5, 2048 }
  0x2c   : > { %p1618_p1 = scmp.ne.s32.totalorder %s2335_s5, %s1617_s22  ;;  %p1624_p6 = scmp.lt.u32.totalorder %s1617_s22, %s2335_s5 }
  0x2e   : > { %p1620_p2 = pnand %p1618_p1, %p1591_p12 }
  0x30   : > { %p1621_p4 = pneg %p1620_p2 }
  0x32   : > { %p1626_p8 = pnand %p1624_p6, %p1621_p4 }
  0x34   : > { %1629 = shalt.err (!%p1626_p8)
}
  0x35   : > { %s1630_s16 = scalar_lea.vmem %s1858_s19, 2048  ;;  %p1638_p3 = scmp.lt.s32.totalorder %s1858_s19, %s1858_s19 }
  0x36   : > { %p1631_p11 = scmp.ne.s32.totalorder %s1858_s19, %s1630_s16  ;;  %p1639_p5 = scmp.lt.s32.totalorder %s1630_s16, %s1630_s16 }
  0x38   : > { %p1633_p13 = pnand %p1631_p11, %p1591_p12  ;;  %p1640_p7 = por %p1639_p5, %p1638_p3 }
  0x3a   : > { %p1634_p0 = pneg %p1633_p13 }
  0x3c   : > { %p1641_p9 = pnand %p1640_p7, %p1634_p0 }
  0x3e   : > { %1644 = shalt.err (!%p1641_p9)
}
  0x3f   : > { %s1751_s27 = smov 64   ;;  %s1752_s15 = smov 4  }
  0x40   : > { %1445 = dma.hbm_to_vmem [thread:$0]  (!%p1854_p10), %s2335_s5, 2048, %s1858_s19, [#allocation7], %s1751_s27, %s1751_s27, %s1752_s15  }
  0x41   : > { %s1911_s21 = sadd.s32 1, %s1745_s10   ;;  %s33_s23 = sadd.s32 1, %s1741_s9 }
  0x42   : > { %s30_s22 = ssub.s32 %s1745_s10, %s1911_s21  ;;  %p40_p1 = scmp.ne.s32.totalorder %s1741_s9, %s1737_s30 }
  0x43   : > { %p31_p12 = scmp.eq.s32.totalorder %s30_s22, 0  ;;  %p41_p2 = scmp.eq.s32.totalorder %s1745_s10, 0 }
  0x44   : > { %p2347_p6 = scmp.eq.s32.totalorder %s1827_s7, 3  ;;  %p1456_p11 = scmp.lt.s32.totalorder %s1745_s10, 4 }
  0x45   : > { %s1920_s24 = scalar_select %p31_p12, %s1741_s9, %s33_s23  }
  0x46   : > { %p42_p4 = por %p41_p2, %p40_p1  ;;  %p1924_p8 = por %p2347_p6, %p40_p1 }
  0x47   : > { %s284_s17 = sand.u32 1, %s1741_s9   ;;  %s1361_s19 = sshll.u32 %s1745_s10, 11 }
  0x48   : > { %s1313_s26 = sshll.u32 %s284_s17, 7  ;;  %s1934_s15 = scalar_lea.hbm %s2330_s0, %s1361_s19 }
  0x49   : > { %s288_s18 = scalar_lea.vmem [#allocation3], %s1313_s26  ;;  %p1938_p10 = pnand %p1456_p11, %p42_p4 }
  0x4a   : > { %s295_s20 = sshll.u32 %s288_s18, 4  ;;  %s1942_s23 = scalar_lea.sflag [#allocation4], %s284_s17  ;;  %s1936_s20 = int_to_ptr.vmem [resolvable:$true] %s295_s20 }
  0x4b   : > { %s1645_s28 = scalar_lea.hbm %s1934_s15, 2048  ;;  %p1647_p0 = pneg %p1938_p10 }
  0x4c   : > { %p1646_p13 = scmp.ne.s32.totalorder %s1934_s15, %s1645_s28  ;;  %s1650_s16 = scalar_lea.hbm %s2330_s0, 8192 }
  0x4d   : > { %p1651_p7 = scmp.lt.u32.totalorder %s1934_s15, %s2330_s0  ;;  %p1652_p9 = scmp.lt.u32.totalorder %s1650_s16, %s1645_s28 }
  0x4e   : > { %p1648_p3 = pnand %p1647_p0, %p1646_p13  ;;  %p1654_p1 = scmp.lt.u32.totalorder %s1645_s28, %s1934_s15 }
  0x4f   : > { %p1653_p12 = por %p1652_p9, %p1651_p7 }
  0x50   : > { %p1649_p5 = pneg %p1648_p3 }
  0x51   : > { %p1655_p2 = por %p1654_p1, %p1653_p12 }
  0x53   : > { %p1656_p4 = pnand %p1655_p2, %p1649_p5 }
  0x55   : > { %1659 = shalt.err (!%p1656_p4)
}
  0x56   : > { %s1660_s17 = scalar_lea.vmem %s1936_s20, 2048  ;;  %s1753_s26 = smov [#allocation3]  }
  0x57   : > { %p1661_p6 = scmp.ne.s32.totalorder %s1936_s20, %s1660_s17  ;;  %s1665_s19 = sshll.u32 %s1753_s26, 4  ;;  %s1666_s19 = int_to_ptr.vmem [resolvable:$false] %s1665_s19 }
  0x58   : > { %s1667_s27 = scalar_lea.vmem %s1666_s19, 4096  ;;  %p1668_p3 = scmp.lt.s32.totalorder %s1936_s20, %s1666_s19 }
  0x59   : > { %p1663_p11 = pnand %p1661_p6, %p1647_p0  ;;  %p1669_p7 = scmp.lt.s32.totalorder %s1667_s27, %s1660_s17 }
  0x5b   : > { %p1664_p13 = pneg %p1663_p11  ;;  %p1670_p9 = por %p1669_p7, %p1668_p3 }
  0x5d   : > { %p1671_p12 = pnand %p1670_p9, %p1664_p13 }
  0x5f   : > { %1674 = shalt.err (!%p1671_p12)
}
  0x60   : > { %s2350_s28 = smov 128   ;;  %p2351_p0 = scmp.ne.s32.totalorder %s2345_s14, 0 }
  0x61   : > { %1449 = dma.hbm_to_vmem [thread:$0]  (!%p1938_p10), %s1934_s15, 2048, %s1936_s20, %s1942_s23, %s2350_s28, %s2350_s28, %s1750_s11  }
  0x62   : > { %307 = sbr.rel (%p2351_p0) target bundleno = 947 (0x3b3), region = 52  ;;  %s1976_s16 = sand.u32 (!%p2351_p0), 1, %s1737_s30  }
  0x63   : > { %s1317_s18 = sshll.u32 (!%p2351_p0), %s1976_s16, 7  ;;  %s310_s17 = scalar_lea.sflag (!%p2351_p0), [#allocation4], %s1976_s16 }
  0x64   : > { %s1982_s22 = scalar_lea.vmem (!%p2351_p0), [#allocation3], %s1317_s18  ;;  %p2352_p5 = scmp.ne.s32.totalorder (!%p2351_p0), %s2343_s12, 0 }
  0x69   : > { %1720 = dma.done.wait (%p2352_p5), %s310_s17, 2048  }
  0x6a   : > { %1722 = vsyncadd (%p2352_p5), %s310_s17, 4294965248  ;;  %p2353_p10 = scmp.eq.s32.totalorder %s1827_s7, 0 }
  0x6c   : > { %1724 = dma.done.wait (%p2353_p10), [#allocation7], 4096   ;;  %p2354_p1 = pmov %p2353_p10 }
  0x6d   : > { %v357_v0 = vld [vmem:[%s1982_s22] sm:$0xff]  ;;  %v359_v1 = vld [vmem:[%s1982_s22 + $0x10] sm:$0xff]  ;;  %v358_v2 = vld [vmem:[%s1982_s22 + $0x8] sm:$0xff]  ;;  %s1152_s26 = sld [smem:[#allocation2]]  ;;  %s2219_s28 = scalar_lea.vmem [#allocation9], %s1317_s18 }
  0x6e   : > { %1726 = vsyncadd (%p2354_p1), [#allocation7], 4294963200  ;;  %373 = vadd.xlane.f32.xlu0 %v357_v0  ;;  %377 = vadd.xlane.f32.xlu1 %v359_v1  ;;  %v360_v3 = vld [vmem:[%s1982_s22 + $0x18] sm:$0xff]  ;;  %v361_v4 = vld [vmem:[%s1982_s22 + $0x20] sm:$0xff]  ;;  %s1362_s18 = sshll.u32 %s1827_s7, 11  ;;  %s1216_s17 = sshll.u32 %s2219_s28, 4  ;;  %s2284_s17 = int_to_ptr.vmem [resolvable:$true] %s1216_s17 }
  0x6f   : > { %v362_v5 = vld [vmem:[%s1982_s22 + $0x28] sm:$0xff]  ;;  %v363_v6 = vld [vmem:[%s1982_s22 + $0x30] sm:$0xff]  ;;  %v364_v7 = vld [vmem:[%s1982_s22 + $0x38] sm:$0xff]  ;;  %s2282_s11 = scalar_lea.hbm %s2338_s8, %s1362_s18  ;;  %s1203_s7 = scalar_lea.sflag [#allocation5], %s1976_s16 }
  0x70   : > { %v365_v8 = vld [vmem:[%s1982_s22 + $0x40] sm:$0xff]  ;;  %v2002_v9 = vld [vmem:[%s1982_s22 + $0x48] sm:$0xff]  ;;  %v2005_v10 = vld [vmem:[%s1982_s22 + $0x50] sm:$0xff]  ;;  %s1675_s15 = scalar_lea.vmem %s2284_s17, 2048  ;;  %s1755_s20 = smov [#allocation9]  }
  0x71   : > { %v2008_v11 = vld [vmem:[%s1982_s22 + $0x58] sm:$0xff]  ;;  %v2014_v12 = vld [vmem:[%s1982_s22 + $0x60] sm:$0xff]  ;;  %v2017_v13 = vld [vmem:[%s1982_s22 + $0x68] sm:$0xff]  ;;  %p1676_p2 = scmp.ne.s32.totalorder %s2284_s17, %s1675_s15  ;;  %s1679_s23 = sshll.u32 %s1755_s20, 4  ;;  %s1680_s23 = int_to_ptr.vmem [resolvable:$false] %s1679_s23 }
  0x72   : > { %375 = vadd.xlane.f32.xlu0 %v358_v2  ;;  %379 = vadd.xlane.f32.xlu1 %v360_v3  ;;  %v2022_v14 = vld [vmem:[%s1982_s22 + $0x70] sm:$0xff]  ;;  %v2025_v15 = vld [vmem:[%s1982_s22 + $0x78] sm:$0xff]  ;;  %v1501_v16 = vld [vmem:[#allocation6 + $0x4] ss:$8 sps:$4 sm:$0xff]   ;;  %p1682_p11 = scmp.lt.s32.totalorder %s2284_s17, %s1680_s23 }
  0x73   : > { %v1503_v17 = vld [vmem:[#allocation6] ss:$8 sps:$4 sm:$0xff]   ;;  %727 = vmatprep.subr.bf16.mxu0 %v1501_v16  ;;  %v1504_v58 = vld [vmem:[#allocation6 + $0x14] ss:$8 sps:$4 sm:$0xff]   ;;  %v1506_v62 = vld [vmem:[#allocation6 + $0x10] ss:$8 sps:$4 sm:$0xff]   ;;  %p1677_p4 = pnand %p1676_p2, %p1924_p8 }
  0x74   : > { %728 = vmatpush1.bf16.msra.mxu0 %v1503_v17 }
  0x75   : > { %729 = vmatprep.subr.bf16.mxu0 %v1504_v58  ;;  %p1678_p6 = pneg %p1677_p4 }
  0x76   : > { %381 = vadd.xlane.f32.xlu0 %v361_v4  ;;  %383 = vadd.xlane.f32.xlu1 %v362_v5 }
  0x78   : > { %730 = vmatpush1.bf16.msra.mxu0 %v1506_v62 }
  0x7a   : > { %385 = vadd.xlane.f32.xlu0 %v363_v6  ;;  %387 = vadd.xlane.f32.xlu1 %v364_v7 }
  0x7e   : > { %389 = vadd.xlane.f32.xlu0 %v365_v8  ;;  %391 = vadd.xlane.f32.xlu1 %v2002_v9 }
  0x82   : > { %393 = vadd.xlane.f32.xlu0 %v2005_v10  ;;  %395 = vadd.xlane.f32.xlu1 %v2008_v11 }
  0x86   : > { %397 = vadd.xlane.f32.xlu0 %v2014_v12  ;;  %399 = vadd.xlane.f32.xlu1 %v2017_v13 }
  0x8a   : > { %401 = vadd.xlane.f32.xlu0 %v2022_v14  ;;  %403 = vadd.xlane.f32.xlu1 %v2025_v15 }
  0xfb   : > { %v374_v18 = vpop.xlane.xlu0 %373  ;;  %v378_v19 = vpop.xlane.xlu1 %377 }
  0xfc   : > { %v405_v20 = vmul.f32 0.0078125, %v374_v18  ;;  %v407_v21 = vmul.f32 0.0078125, %v378_v19 }
  0xfe   : > { %v2029_v22 = vsub.f32 %v357_v0, %v405_v20  ;;  %v2031_v23 = vsub.f32 %v359_v1, %v407_v21  ;;  %v1510_v21 = vld [vmem:[#allocation6 + $0x34] ss:$8 sps:$4 sm:$0xff]  }
  0xff   : > { %v376_v24 = vpop.xlane.xlu0 %375  ;;  %v380_v25 = vpop.xlane.xlu1 %379 }
 0x100   : > { %v406_v26 = vmul.f32 0.0078125, %v376_v24  ;;  %v437_v27 = vmul.f32 %v2029_v22, %v2029_v22  ;;  %v408_v28 = vmul.f32 0.0078125, %v380_v25  ;;  %v439_v31 = vmul.f32 %v2031_v23, %v2031_v23 }
 0x102   : > { %v2035_v29 = vsub.f32 %v358_v2, %v406_v26  ;;  %453 = vadd.xlane.f32.xlu0 %v437_v27  ;;  %v2037_v30 = vsub.f32 %v360_v3, %v408_v28  ;;  %v1513_v27 = vld [vmem:[#allocation6 + $0x44] ss:$8 sps:$4 sm:$0xff]   ;;  %v1515_v28 = vld [vmem:[#allocation6 + $0x40] ss:$8 sps:$4 sm:$0xff]  }
 0x103   : > { %v382_v32 = vpop.xlane.xlu0 %381  ;;  %v384_v33 = vpop.xlane.xlu1 %383 }
 0x104   : > { %v409_v34 = vmul.f32 0.0078125, %v382_v32  ;;  %v438_v35 = vmul.f32 %v2035_v29, %v2035_v29  ;;  %v410_v36 = vmul.f32 0.0078125, %v384_v33  ;;  %v440_v39 = vmul.f32 %v2037_v30, %v2037_v30  ;;  %v1519_v32 = vld [vmem:[#allocation6 + $0x64] ss:$8 sps:$4 sm:$0xff]   ;;  %v1521_v33 = vld [vmem:[#allocation6 + $0x60] ss:$8 sps:$4 sm:$0xff]  }
 0x106   : > { %v2043_v37 = vsub.f32 %v361_v4, %v409_v34  ;;  %457 = vadd.xlane.f32.xlu0 %v439_v31  ;;  %455 = vadd.xlane.f32.xlu1 %v438_v35  ;;  %v2045_v38 = vsub.f32 %v362_v5, %v410_v36  ;;  %v1516_v31 = vld [vmem:[#allocation6 + $0x54] ss:$8 sps:$4 sm:$0xff]   ;;  %v1524_v35 = vld [vmem:[#allocation6 + $0x70] ss:$8 sps:$4 sm:$0xff]   ;;  %v1754_v36 = vmov 0  }
 0x107   : > { %v386_v40 = vpop.xlane.xlu0 %385  ;;  %v388_v41 = vpop.xlane.xlu1 %387  ;;  %v1522_v34 = vld [vmem:[#allocation6 + $0x74] ss:$8 sps:$4 sm:$0xff]   ;;  %759 = vmatprep.mubr.bf16.mxu0 %v1754_v36 }
 0x108   : > { %v411_v42 = vmul.f32 0.0078125, %v386_v40  ;;  %v441_v43 = vmul.f32 %v2043_v37, %v2043_v37  ;;  %v412_v44 = vmul.f32 0.0078125, %v388_v41  ;;  %v442_v47 = vmul.f32 %v2045_v38, %v2045_v38  ;;  %v1526_v40 = vld [vmem:[#allocation8] sm:$0xff]   ;;  %v1527_v41 = vld [vmem:[#allocation8 + $0x48] sm:$0xff]  }
 0x10a   : > { %v2051_v45 = vsub.f32 %v363_v6, %v411_v42  ;;  %459 = vadd.xlane.f32.xlu1 %v440_v39  ;;  %461 = vadd.xlane.f32.xlu0 %v441_v43  ;;  %v2053_v46 = vsub.f32 %v364_v7, %v412_v44  ;;  %v1507_v7 = vld [vmem:[#allocation6 + $0x24] ss:$8 sps:$4 sm:$0xff]   ;;  %v1529_v43 = vld [vmem:[#allocation8 + $0x50] sm:$0xff]  }
 0x10b   : > { %v390_v48 = vpop.xlane.xlu0 %389  ;;  %v392_v49 = vpop.xlane.xlu1 %391  ;;  %731 = vmatprep.subr.bf16.mxu0 %v1507_v7  ;;  %v1525_v39 = vld [vmem:[#allocation8 + $0x40] sm:$0xff]   ;;  %v1528_v42 = vld [vmem:[#allocation8 + $0x8] sm:$0xff]   ;;  %v1530_v44 = vld [vmem:[#allocation8 + $0x10] sm:$0xff]  }
 0x10c   : > { %v413_v50 = vmul.f32 0.0078125, %v390_v48  ;;  %v443_v51 = vmul.f32 %v2051_v45, %v2051_v45  ;;  %v414_v52 = vmul.f32 0.0078125, %v392_v49  ;;  %v444_v55 = vmul.f32 %v2053_v46, %v2053_v46  ;;  %1363 = vmatprep.subr.bf16.mxu1 %v1525_v39  ;;  %v1532_v48 = vld [vmem:[#allocation8 + $0x18] sm:$0xff]   ;;  %v1533_v49 = vld [vmem:[#allocation8 + $0x60] sm:$0xff]  }
 0x10d   : > { %1364 = vmatpush3.bf16.msra.mxu1 %v1526_v40 }
 0x10e   : > { %v2059_v53 = vsub.f32 %v365_v8, %v413_v50  ;;  %463 = vadd.xlane.f32.xlu1 %v442_v47  ;;  %465 = vadd.xlane.f32.xlu0 %v443_v51  ;;  %v2062_v54 = vsub.f32 %v2002_v9, %v414_v52  ;;  %v1509_v8 = vld [vmem:[#allocation6 + $0x20] ss:$8 sps:$4 sm:$0xff]   ;;  %v1531_v47 = vld [vmem:[#allocation8 + $0x58] sm:$0xff]  }
 0x10f   : > { %v394_v56 = vpop.xlane.xlu0 %393  ;;  %v396_v57 = vpop.xlane.xlu1 %395  ;;  %732 = vmatpush1.bf16.msra.mxu0 %v1509_v8  ;;  %1365 = vmatprep.subr.bf16.mxu1 %v1527_v41  ;;  %v1534_v50 = vld [vmem:[#allocation8 + $0x20] sm:$0xff]  }
 0x110   : > { %v415_v59 = vmul.f32 0.0078125, %v394_v56  ;;  %v445_v60 = vmul.f32 %v2059_v53, %v2059_v53  ;;  %v416_v61 = vmul.f32 0.0078125, %v396_v57  ;;  %v446_v1 = vmul.f32 %v2062_v54, %v2062_v54  ;;  %733 = vmatprep.subr.bf16.mxu0 %v1510_v21 }
 0x111   : > { %1366 = vmatpush3.bf16.msra.mxu1 %v1528_v42 }
 0x112   : > { %v2069_v63 = vsub.f32 %v2005_v10, %v415_v59  ;;  %467 = vadd.xlane.f32.xlu1 %v444_v55  ;;  %469 = vadd.xlane.f32.xlu0 %v445_v60  ;;  %v2072_v0 = vsub.f32 %v2008_v11, %v416_v61 }
 0x113   : > { %v398_v2 = vpop.xlane.xlu0 %397  ;;  %v400_v3 = vpop.xlane.xlu1 %399  ;;  %1367 = vmatprep.subr.bf16.mxu1 %v1529_v43 }
 0x114   : > { %v417_v4 = vmul.f32 0.0078125, %v398_v2  ;;  %v447_v5 = vmul.f32 %v2069_v63, %v2069_v63  ;;  %v418_v6 = vmul.f32 0.0078125, %v400_v3  ;;  %v448_v11 = vmul.f32 %v2072_v0, %v2072_v0 }
 0x115   : > { %1368 = vmatpush3.bf16.msra.mxu1 %v1530_v44 }
 0x116   : > { %v2079_v9 = vsub.f32 %v2014_v12, %v417_v4  ;;  %471 = vadd.xlane.f32.xlu1 %v446_v1  ;;  %473 = vadd.xlane.f32.xlu0 %v447_v5  ;;  %v2082_v10 = vsub.f32 %v2017_v13, %v418_v6  ;;  %v1512_v12 = vld [vmem:[#allocation6 + $0x30] ss:$8 sps:$4 sm:$0xff]  }
 0x117   : > { %v402_v16 = vpop.xlane.xlu0 %401  ;;  %v404_v17 = vpop.xlane.xlu1 %403  ;;  %734 = vmatpush1.bf16.msra.mxu0 %v1512_v12  ;;  %1369 = vmatprep.subr.bf16.mxu1 %v1531_v47 }
 0x118   : > { %v419_v18 = vmul.f32 0.0078125, %v402_v16  ;;  %v449_v19 = vmul.f32 %v2079_v9, %v2079_v9  ;;  %v420_v20 = vmul.f32 0.0078125, %v404_v17  ;;  %v450_v25 = vmul.f32 %v2082_v10, %v2082_v10  ;;  %735 = vmatprep.subr.bf16.mxu0 %v1513_v27 }
 0x119   : > { %1370 = vmatpush3.bf16.msra.mxu1 %v1532_v48 }
 0x11a   : > { %v2089_v24 = vsub.f32 %v2022_v14, %v419_v18  ;;  %475 = vadd.xlane.f32.xlu1 %v448_v11  ;;  %477 = vadd.xlane.f32.xlu0 %v449_v19  ;;  %v2092_v13 = vsub.f32 %v2025_v15, %v420_v20  ;;  %v1518_v15 = vld [vmem:[#allocation6 + $0x50] ss:$8 sps:$4 sm:$0xff]  }
 0x11b   : > { %736 = vmatpush1.bf16.msra.mxu0 %v1515_v28  ;;  %1371 = vmatprep.subr.bf16.mxu1 %v1533_v49 }
 0x11c   : > { %v451_v26 = vmul.f32 %v2089_v24, %v2089_v24  ;;  %v452_v14 = vmul.f32 %v2092_v13, %v2092_v13  ;;  %737 = vmatprep.subr.bf16.mxu0 %v1516_v31  ;;  %v2105_v31 = vld [vmem:[%s2331_s1] ss:$0 sm:$0xff] }
 0x11d   : > { %1372 = vmatpush3.bf16.msra.mxu1 %v1534_v50 }
 0x11e   : > { %479 = vadd.xlane.f32.xlu1 %v450_v25  ;;  %481 = vadd.xlane.f32.xlu0 %v451_v26 }
 0x11f   : > { %738 = vmatpush1.bf16.msra.mxu0 %v1518_v15 }
 0x120   : > { %739 = vmatprep.subr.bf16.mxu0 %v1519_v32 }
 0x122   : > { %483 = vadd.xlane.f32.xlu1 %v452_v14 }
 0x123   : > { %740 = vmatpush1.bf16.msra.mxu0 %v1521_v33 }
 0x124   : > { %741 = vmatprep.subr.bf16.mxu0 %v1522_v34 }
 0x127   : > { %742 = vmatpush1.bf16.msra.mxu0 %v1524_v35 }
 0x18f   : > { %v454_v51 = vpop.xlane.xlu0 %453 }
 0x190   : > { %v485_v52 = vmax.f32 %v454_v51, 0.0 }
 0x192   : > { %v501_v55 = vmul.f32 0.0078125, %v485_v52 }
 0x193   : > { %v456_v56 = vpop.xlane.xlu1 %455  ;;  %v458_v57 = vpop.xlane.xlu0 %457 }
 0x194   : > { %v517_v58 = vadd.f32 1e-05, %v501_v55  ;;  %v486_v59 = vmax.f32 %v456_v56, 0.0  ;;  %v487_v60 = vmax.f32 %v458_v57, 0.0 }
 0x196   : > { %1541 = vrsqrt.f32 %v517_v58  ;;  %v502_v61 = vmul.f32 0.0078125, %v486_v59  ;;  %v503_v62 = vmul.f32 0.0078125, %v487_v60 }
 0x197   : > { %v460_v1 = vpop.xlane.xlu1 %459  ;;  %v462_v2 = vpop.xlane.xlu0 %461 }
 0x198   : > { %v518_v3 = vadd.f32 1e-05, %v502_v61  ;;  %v519_v4 = vadd.f32 1e-05, %v503_v62  ;;  %v488_v5 = vmax.f32 %v460_v1, 0.0  ;;  %v489_v6 = vmax.f32 %v462_v2, 0.0 }
 0x19a   : > { %1543 = vrsqrt.f32 %v518_v3  ;;  %v504_v7 = vmul.f32 0.0078125, %v488_v5  ;;  %v505_v16 = vmul.f32 0.0078125, %v489_v6 }
 0x19b   : > { %v464_v8 = vpop.xlane.xlu1 %463  ;;  %1545 = vrsqrt.f32 %v519_v4  ;;  %v466_v18 = vpop.xlane.xlu0 %465 }
 0x19c   : > { %v520_v11 = vadd.f32 1e-05, %v504_v7  ;;  %v490_v17 = vmax.f32 %v464_v8, 0.0  ;;  %v521_v12 = vadd.f32 1e-05, %v505_v16  ;;  %v491_v26 = vmax.f32 %v466_v18, 0.0 }
 0x19e   : > { %1547 = vrsqrt.f32 %v520_v11  ;;  %v506_v19 = vmul.f32 0.0078125, %v490_v17  ;;  %v507_v33 = vmul.f32 0.0078125, %v491_v26 }
 0x19f   : > { %v468_v20 = vpop.xlane.xlu1 %467  ;;  %v470_v34 = vpop.xlane.xlu0 %469 }
 0x1a0   : > { %v1542_v21 = vpop.eup %1541  ;;  %v522_v25 = vadd.f32 1e-05, %v506_v19  ;;  %v492_v27 = vmax.f32 %v468_v20, 0.0  ;;  %v523_v47 = vadd.f32 1e-05, %v507_v33  ;;  %v493_v48 = vmax.f32 %v470_v34, 0.0 }
 0x1a1   : > { %v549_v28 = vmul.f32 %v1542_v21, %v2029_v22  ;;  %v2112_v22 = vld [vmem:[%s2332_s2] ss:$0 sm:$0xff] }
 0x1a2   : > { %1549 = vrsqrt.f32 %v522_v25  ;;  %v508_v14 = vmul.f32 0.0078125, %v492_v27  ;;  %v509_v59 = vmul.f32 0.0078125, %v493_v48 }
 0x1a3   : > { %v472_v15 = vpop.xlane.xlu1 %471  ;;  %1551 = vrsqrt.f32 %v521_v12  ;;  %v572_v39 = vmul.f32 %v2105_v31, %v549_v28  ;;  %v474_v60 = vpop.xlane.xlu0 %473 }
 0x1a4   : > { %v1544_v32 = vpop.eup %1543  ;;  %v524_v41 = vadd.f32 1e-05, %v508_v14  ;;  %v494_v42 = vmax.f32 %v472_v15, 0.0  ;;  %v525_v3 = vadd.f32 1e-05, %v509_v59  ;;  %v495_v4 = vmax.f32 %v474_v60, 0.0 }
 0x1a5   : > { %v550_v35 = vmul.f32 %v1544_v32, %v2035_v29  ;;  %v1546_v40 = vpop.eup %1545  ;;  %v595_v49 = vadd.f32 %v2112_v22, %v572_v39 }
 0x1a6   : > { %v551_v29 = vmul.f32 %v1546_v40, %v2031_v23  ;;  %1553 = vrsqrt.f32 %v524_v41  ;;  %v510_v52 = vmul.f32 0.0078125, %v494_v42  ;;  %v511_v18 = vmul.f32 0.0078125, %v495_v4 }
 0x1a7   : > { %v573_v43 = vmul.f32 %v2105_v31, %v550_v35  ;;  %v476_v55 = vpop.xlane.xlu1 %475  ;;  %1555 = vrsqrt.f32 %v523_v47  ;;  %v478_v19 = vpop.xlane.xlu0 %477 }
 0x1a8   : > { %v1548_v44 = vpop.eup %1547  ;;  %v574_v61 = vmul.f32 %v2105_v31, %v551_v29  ;;  %v526_v1 = vadd.f32 1e-05, %v510_v52  ;;  %v496_v2 = vmax.f32 %v476_v55, 0.0  ;;  %v527_v26 = vadd.f32 1e-05, %v511_v18 }
 0x1a9   : > { %v596_v50 = vadd.f32 %v2112_v22, %v573_v43  ;;  %v552_v51 = vmul.f32 %v1548_v44, %v2037_v30  ;;  %v497_v27 = vmax.f32 %v478_v19, 0.0 }
 0x1aa   : > { %v597_v5 = vadd.f32 %v2112_v22, %v574_v61  ;;  %1557 = vrsqrt.f32 %v526_v1  ;;  %v512_v7 = vmul.f32 0.0078125, %v496_v2 }
 0x1ab   : > { %v611_v56 = vpack.c.bf16 %v596_v50, %v595_v49  ;;  %v575_v57 = vmul.f32 %v2105_v31, %v552_v51  ;;  %v480_v8 = vpop.xlane.xlu1 %479  ;;  %1559 = vrsqrt.f32 %v525_v3  ;;  %v513_v39 = vmul.f32 0.0078125, %v497_v27  ;;  %v482_v40 = vpop.xlane.xlu0 %481  ;;  %v1539_v27 = vld [vmem:[#allocation8 + $0x78] sm:$0xff]  }
 0x1ac   : > { %v1550_v58 = vpop.eup %1549  ;;  %v528_v21 = vadd.f32 1e-05, %v512_v7  ;;  %v498_v12 = vmax.f32 %v480_v8, 0.0  ;;  %v499_v48 = vmax.f32 %v482_v40, 0.0 }
 0x1ad   : > { %760 = vmatmul.mubr.bf16.vlgmr.msra.gmra.mrb[0].mxu0 %v611_v56  ;;  %v1552_v62 = vpop.eup %1551  ;;  %v598_v23 = vadd.f32 %v2112_v22, %v575_v57  ;;  %v554_v30 = vmul.f32 %v1550_v58, %v2045_v38  ;;  %v529_v47 = vadd.f32 1e-05, %v513_v39 }
 0x1ae   : > { %769 = vmatprep.mubr.bf16.mxu0 %v1754_v36  ;;  %v553_v6 = vmul.f32 %v1552_v62, %v2043_v37  ;;  %1561 = vrsqrt.f32 %v528_v21  ;;  %v514_v15 = vmul.f32 0.0078125, %v498_v12  ;;  %v515_v56 = vmul.f32 0.0078125, %v499_v48 }
 0x1af   : > { %v612_v11 = vpack.c.bf16 %v598_v23, %v597_v5  ;;  %v577_v16 = vmul.f32 %v2105_v31, %v554_v30  ;;  %v484_v32 = vpop.xlane.xlu1 %483  ;;  %1563 = vrsqrt.f32 %v527_v26  ;;  %v1537_v26 = vld [vmem:[#allocation8 + $0x70] sm:$0xff]  }
 0x1b0   : > { %v1554_v17 = vpop.eup %1553  ;;  %v576_v20 = vmul.f32 %v2105_v31, %v553_v6  ;;  %v530_v42 = vadd.f32 1e-05, %v514_v15  ;;  %v500_v43 = vmax.f32 %v484_v32, 0.0 }
 0x1b1   : > { %v1556_v38 = vpop.eup %1555  ;;  %v600_v37 = vadd.f32 %v2112_v22, %v577_v16  ;;  %v556_v25 = vmul.f32 %v1554_v17, %v2053_v46 }
 0x1b2   : > { %v599_v28 = vadd.f32 %v2112_v22, %v576_v20  ;;  %v555_v14 = vmul.f32 %v1556_v38, %v2051_v45  ;;  %1565 = vrsqrt.f32 %v530_v42  ;;  %v516_v29 = vmul.f32 0.0078125, %v500_v43 }
 0x1b3   : > { %v579_v34 = vmul.f32 %v2105_v31, %v556_v25  ;;  %1567 = vrsqrt.f32 %v529_v47  ;;  %v1535_v25 = vld [vmem:[#allocation8 + $0x68] sm:$0xff]  }
 0x1b4   : > { %v613_v33 = vpack.c.bf16 %v600_v37, %v599_v28  ;;  %v1558_v35 = vpop.eup %1557  ;;  %v578_v41 = vmul.f32 %v2105_v31, %v555_v14  ;;  %v532_v59 = vadd.f32 1e-05, %v516_v29  ;;  %1373 = vmatprep.subr.bf16.mxu1 %v1535_v25  ;;  %v1540_v28 = vld [vmem:[#allocation8 + $0x38] sm:$0xff]  }
 0x1b5   : > { %770 = vmatmul.mubr.bf16.gmra.mrb[4].mxu0 %v612_v11  ;;  %v1560_v46 = vpop.eup %1559  ;;  %v602_v45 = vadd.f32 %v2112_v22, %v579_v34  ;;  %v558_v44 = vmul.f32 %v1558_v35, %v2062_v54 }
 0x1b6   : > { %779 = vmatprep.mubr.bf16.mxu0 %v1754_v36  ;;  %v601_v49 = vadd.f32 %v2112_v22, %v578_v41  ;;  %v557_v50 = vmul.f32 %v1560_v46, %v2059_v53  ;;  %v531_v53 = vadd.f32 1e-05, %v515_v56  ;;  %1569 = vrsqrt.f32 %v532_v59 }
 0x1b7   : > { %v581_v52 = vmul.f32 %v2105_v31, %v558_v44 }
 0x1b8   : > { %v614_v51 = vpack.c.bf16 %v602_v45, %v601_v49  ;;  %v1562_v55 = vpop.eup %1561  ;;  %v580_v57 = vmul.f32 %v2105_v31, %v557_v50  ;;  %1571 = vrsqrt.f32 %v531_v53 }
 0x1b9   : > { %v1564_v58 = vpop.eup %1563  ;;  %v604_v54 = vadd.f32 %v2112_v22, %v581_v52  ;;  %v560_v60 = vmul.f32 %v1562_v55, %v2072_v0 }
 0x1ba   : > { %v603_v61 = vadd.f32 %v2112_v22, %v580_v57  ;;  %v559_v62 = vmul.f32 %v1564_v58, %v2069_v63 }
 0x1bb   : > { %v583_v2 = vmul.f32 %v2105_v31, %v560_v60 }
 0x1bc   : > { %v615_v1 = vpack.c.bf16 %v604_v54, %v603_v61  ;;  %v1566_v23 = vpop.eup %1565  ;;  %v582_v30 = vmul.f32 %v2105_v31, %v559_v62 }
 0x1bd   : > { %780 = vmatmul.mubr.bf16.gmra.mrb[8].mxu0 %v613_v33  ;;  %v1568_v3 = vpop.eup %1567  ;;  %v606_v4 = vadd.f32 %v2112_v22, %v583_v2  ;;  %v562_v0 = vmul.f32 %v1566_v23, %v2082_v10 }
 0x1be   : > { %789 = vmatprep.mubr.bf16.mxu0 %v1754_v36  ;;  %v605_v5 = vadd.f32 %v2112_v22, %v582_v30  ;;  %v561_v63 = vmul.f32 %v1568_v3, %v2079_v9 }
 0x1bf   : > { %v585_v7 = vmul.f32 %v2105_v31, %v562_v0 }
 0x1c0   : > { %v616_v6 = vpack.c.bf16 %v606_v4, %v605_v5  ;;  %v1570_v8 = vpop.eup %1569  ;;  %v584_v11 = vmul.f32 %v2105_v31, %v561_v63 }
 0x1c1   : > { %v608_v17 = vadd.f32 %v2112_v22, %v585_v7  ;;  %v564_v18 = vmul.f32 %v1570_v8, %v2092_v13  ;;  %v1536_v13 = vld [vmem:[#allocation8 + $0x28] sm:$0xff]  }
 0x1c2   : > { %v1572_v16 = vpop.eup %1571  ;;  %v607_v10 = vadd.f32 %v2112_v22, %v584_v11  ;;  %1374 = vmatpush3.bf16.msra.mxu1 %v1536_v13 }
 0x1c3   : > { %v563_v19 = vmul.f32 %v1572_v16, %v2089_v24  ;;  %v587_v9 = vmul.f32 %v2105_v31, %v564_v18  ;;  %v1538_v24 = vld [vmem:[#allocation8 + $0x30] sm:$0xff]   ;;  %1375 = vmatprep.subr.bf16.mxu1 %v1537_v26 }
 0x1c4   : > { %v617_v20 = vpack.c.bf16 %v608_v17, %v607_v10 }
 0x1c5   : > { %790 = vmatmul.mubr.bf16.gmra.mrb[12].mxu0 %v614_v51  ;;  %v586_v38 = vmul.f32 %v2105_v31, %v563_v19  ;;  %v610_v21 = vadd.f32 %v2112_v22, %v587_v9  ;;  %v637_v31 = vlaneseq }
 0x1c6   : > { %799 = vmatprep.mubr.bf16.mxu0 %v1754_v36  ;;  %1376 = vmatpush3.bf16.msra.mxu1 %v1538_v24 }
 0x1c7   : > { %v609_v12 = vadd.f32 %v2112_v22, %v586_v38  ;;  %1377 = vmatprep.subr.bf16.mxu1 %v1539_v27  ;;  %v635_v22 = vld [vmem:[%s2334_s4] sm:$0x3] }
 0x1c9   : > { %v618_v37 = vpack.c.bf16 %v610_v21, %v609_v12 }
 0x1ca   : > { %1378 = vmatpush3.bf16.msra.mxu1 %v1540_v28 }
 0x1cd   : > { %800 = vmatmul.mubr.bf16.gmra.mrb[16].mxu0 %v615_v1 }
 0x1ce   : > { %809 = vmatprep.mubr.bf16.mxu0 %v1754_v36 }
 0x1d5   : > { %810 = vmatmul.mubr.bf16.gmra.mrb[20].mxu0 %v616_v6 }
 0x1d6   : > { %819 = vmatprep.mubr.bf16.mxu0 %v1754_v36 }
 0x1dd   : > { %820 = vmatmul.mubr.bf16.gmra.mrb[24].mxu0 %v617_v20 }
 0x1de   : > { %829 = vmatprep.mubr.bf16.mxu0 %v1754_v36  ;;  %v638_v36 = vshrl.u32 %v637_v31, 7 }
 0x1e0   : > { %v639_v14 = vsub.s32 0, %v638_v36  ;;  %v643_v15 = vsub.s32 1, %v638_v36 }
 0x1e2   : > { %v2169_v32 = vrot.slane %v635_v22, %v639_v14  ;;  %v2171_v33 = vrot.slane %v635_v22, %v643_v15 }
 0x1e5   : > { %830 = vmatmul.mubr.bf16.gmra.mrb[28].mxu0 %v618_v37 }
 0x280   : > { %v761_v34 = vpop.f32.mrb[0].mxu0 }
 0x281   : > { %v762_v35 = vadd.f32 %v761_v34, %v2169_v32  ;;  %v763_v39 = vpop.f32.mrb[1].mxu0 }
 0x282   : > { %v764_v40 = vadd.f32 %v763_v39, %v2171_v33  ;;  %v765_v41 = vpop.f32.mrb[2].mxu0 }
 0x283   : > { %v840_v46 = vmul.f32 0.1, %v762_v35  ;;  %v766_v42 = vadd.f32 %v765_v41, %v2169_v32  ;;  %v767_v43 = vpop.f32.mrb[3].mxu0 }
 0x284   : > { %v841_v45 = vmul.f32 0.1, %v764_v40  ;;  %v768_v44 = vadd.f32 %v767_v43, %v2171_v33 }
 0x285   : > { %v842_v47 = vmul.f32 0.1, %v766_v42  ;;  %v872_v49 = vmax.f32 %v762_v35, %v840_v46 }
 0x286   : > { %v843_v48 = vmul.f32 0.1, %v768_v44  ;;  %v873_v51 = vmax.f32 %v764_v40, %v841_v45 }
 0x287   : > { %v874_v50 = vmax.f32 %v766_v42, %v842_v47 }
 0x288   : > { %v771_v29 = vpop.f32.mrb[4].mxu0  ;;  %v875_v52 = vmax.f32 %v768_v44, %v843_v48 }
 0x289   : > { %v772_v55 = vadd.f32 %v771_v29, %v2169_v32  ;;  %v773_v56 = vpop.f32.mrb[5].mxu0  ;;  %v904_v57 = vpack.c.bf16 %v874_v50, %v872_v49 }
 0x28a   : > { %v774_v58 = vadd.f32 %v773_v56, %v2171_v33  ;;  %v775_v59 = vpop.f32.mrb[6].mxu0  ;;  %v905_v54 = vpack.c.bf16 %v875_v52, %v873_v51 }
 0x28b   : > { %v844_v60 = vmul.f32 0.1, %v772_v55  ;;  %v776_v53 = vadd.f32 %v775_v59, %v2169_v32  ;;  %v777_v61 = vpop.f32.mrb[7].mxu0 }
 0x28c   : > { %v845_v62 = vmul.f32 0.1, %v774_v58  ;;  %v778_v1 = vadd.f32 %v777_v61, %v2171_v33  ;;  %1087 = vmatprep.mubr.bf16.mxu1 %v905_v54 }
 0x28d   : > { %v846_v2 = vmul.f32 0.1, %v776_v53  ;;  %1088 = vmatmul.mubr.bf16.vlgmr.msra.gmra.mrb[0].mxu1 %v904_v57  ;;  %v876_v30 = vmax.f32 %v772_v55, %v844_v60 }
 0x28e   : > { %v847_v23 = vmul.f32 0.1, %v778_v1  ;;  %v877_v4 = vmax.f32 %v774_v58, %v845_v62 }
 0x28f   : > { %v878_v3 = vmax.f32 %v776_v53, %v846_v2 }
 0x290   : > { %v879_v0 = vmax.f32 %v778_v1, %v847_v23  ;;  %v781_v5 = vpop.f32.mrb[8].mxu0 }
 0x291   : > { %v782_v63 = vadd.f32 %v781_v5, %v2169_v32  ;;  %v783_v6 = vpop.f32.mrb[9].mxu0  ;;  %v906_v7 = vpack.c.bf16 %v878_v3, %v876_v30 }
 0x292   : > { %v784_v8 = vadd.f32 %v783_v6, %v2171_v33  ;;  %v785_v11 = vpop.f32.mrb[10].mxu0  ;;  %v907_v16 = vpack.c.bf16 %v879_v0, %v877_v4 }
 0x293   : > { %v848_v17 = vmul.f32 0.1, %v782_v63  ;;  %v786_v18 = vadd.f32 %v785_v11, %v2169_v32  ;;  %v787_v10 = vpop.f32.mrb[11].mxu0 }
 0x294   : > { %v849_v19 = vmul.f32 0.1, %v784_v8  ;;  %v788_v20 = vadd.f32 %v787_v10, %v2171_v33  ;;  %1095 = vmatprep.mubr.bf16.mxu1 %v907_v16 }
 0x295   : > { %v850_v9 = vmul.f32 0.1, %v786_v18  ;;  %1096 = vmatmul.mubr.bf16.gmra.mrb[4].mxu1 %v906_v7  ;;  %v880_v21 = vmax.f32 %v782_v63, %v848_v17 }
 0x296   : > { %v851_v38 = vmul.f32 0.1, %v788_v20  ;;  %v881_v37 = vmax.f32 %v784_v8, %v849_v19 }
 0x297   : > { %v882_v12 = vmax.f32 %v786_v18, %v850_v9 }
 0x298   : > { %v883_v25 = vmax.f32 %v788_v20, %v851_v38  ;;  %v791_v13 = vpop.f32.mrb[12].mxu0 }
 0x299   : > { %v792_v26 = vadd.f32 %v791_v13, %v2169_v32  ;;  %v793_v24 = vpop.f32.mrb[13].mxu0  ;;  %v908_v27 = vpack.c.bf16 %v882_v12, %v880_v21 }
 0x29a   : > { %v794_v28 = vadd.f32 %v793_v24, %v2171_v33  ;;  %v795_v31 = vpop.f32.mrb[14].mxu0  ;;  %v909_v36 = vpack.c.bf16 %v883_v25, %v881_v37 }
 0x29b   : > { %v852_v14 = vmul.f32 0.1, %v792_v26  ;;  %v796_v22 = vadd.f32 %v795_v31, %v2169_v32  ;;  %v797_v15 = vpop.f32.mrb[15].mxu0 }
 0x29c   : > { %v853_v34 = vmul.f32 0.1, %v794_v28  ;;  %v798_v35 = vadd.f32 %v797_v15, %v2171_v33  ;;  %1103 = vmatprep.mubr.bf16.mxu1 %v909_v36 }
 0x29d   : > { %v854_v39 = vmul.f32 0.1, %v796_v22  ;;  %1104 = vmatmul.mubr.bf16.gmra.mrb[8].mxu1 %v908_v27  ;;  %v884_v41 = vmax.f32 %v792_v26, %v852_v14 }
 0x29e   : > { %v855_v40 = vmul.f32 0.1, %v798_v35  ;;  %v885_v42 = vmax.f32 %v794_v28, %v853_v34 }
 0x29f   : > { %v886_v46 = vmax.f32 %v796_v22, %v854_v39 }
 0x2a0   : > { %v887_v43 = vmax.f32 %v798_v35, %v855_v40  ;;  %v801_v45 = vpop.f32.mrb[16].mxu0 }
 0x2a1   : > { %v802_v44 = vadd.f32 %v801_v45, %v2169_v32  ;;  %v803_v47 = vpop.f32.mrb[17].mxu0  ;;  %v910_v48 = vpack.c.bf16 %v886_v46, %v884_v41 }
 0x2a2   : > { %v804_v49 = vadd.f32 %v803_v47, %v2171_v33  ;;  %v805_v50 = vpop.f32.mrb[18].mxu0  ;;  %v911_v29 = vpack.c.bf16 %v887_v43, %v885_v42 }
 0x2a3   : > { %v856_v51 = vmul.f32 0.1, %v802_v44  ;;  %v806_v52 = vadd.f32 %v805_v50, %v2169_v32  ;;  %v807_v55 = vpop.f32.mrb[19].mxu0 }
 0x2a4   : > { %v857_v56 = vmul.f32 0.1, %v804_v49  ;;  %v808_v57 = vadd.f32 %v807_v55, %v2171_v33  ;;  %1111 = vmatprep.mubr.bf16.mxu1 %v911_v29 }
 0x2a5   : > { %v858_v58 = vmul.f32 0.1, %v806_v52  ;;  %1112 = vmatmul.mubr.bf16.gmra.mrb[12].mxu1 %v910_v48  ;;  %v888_v54 = vmax.f32 %v802_v44, %v856_v51 }
 0x2a6   : > { %v859_v59 = vmul.f32 0.1, %v808_v57  ;;  %v889_v53 = vmax.f32 %v804_v49, %v857_v56 }
 0x2a7   : > { %v890_v60 = vmax.f32 %v806_v52, %v858_v58 }
 0x2a8   : > { %v891_v61 = vmax.f32 %v808_v57, %v859_v59  ;;  %v811_v62 = vpop.f32.mrb[20].mxu0 }
 0x2a9   : > { %v812_v1 = vadd.f32 %v811_v62, %v2169_v32  ;;  %v813_v2 = vpop.f32.mrb[21].mxu0  ;;  %v912_v23 = vpack.c.bf16 %v890_v60, %v888_v54  ;;  %v2210_v60 = vstv %s1152_s26  ;;  %s1681_s26 = scalar_lea.vmem %s1680_s23, 4096 }
 0x2aa   : > { %v814_v30 = vadd.f32 %v813_v2, %v2171_v33  ;;  %v815_v3 = vpop.f32.mrb[22].mxu0  ;;  %v913_v4 = vpack.c.bf16 %v891_v61, %v889_v53  ;;  %p1683_p13 = scmp.lt.s32.totalorder %s1681_s26, %s1675_s15 }
 0x2ab   : > { %v860_v0 = vmul.f32 0.1, %v812_v1  ;;  %v816_v5 = vadd.f32 %v815_v3, %v2169_v32  ;;  %v817_v63 = vpop.f32.mrb[23].mxu0 }
 0x2ac   : > { %v861_v6 = vmul.f32 0.1, %v814_v30  ;;  %v818_v7 = vadd.f32 %v817_v63, %v2171_v33  ;;  %1119 = vmatprep.mubr.bf16.mxu1 %v913_v4  ;;  %p1684_p3 = por %p1683_p13, %p1682_p11 }
 0x2ad   : > { %v862_v8 = vmul.f32 0.1, %v816_v5  ;;  %1120 = vmatmul.mubr.bf16.gmra.mrb[16].mxu1 %v912_v23  ;;  %v892_v16 = vmax.f32 %v812_v1, %v860_v0  ;;  %v1573_v23 = vld [vmem:[%s1982_s22] sm:$0xff] }
 0x2ae   : > { %v863_v11 = vmul.f32 0.1, %v818_v7  ;;  %v893_v18 = vmax.f32 %v814_v30, %v861_v6  ;;  %p1685_p7 = pnand %p1684_p3, %p1678_p6 }
 0x2af   : > { %v894_v17 = vmax.f32 %v816_v5, %v862_v8  ;;  %v1574_v5 = vld [vmem:[%s1982_s22 + $0x8] sm:$0xff] }
 0x2b0   : > { %v895_v10 = vmax.f32 %v818_v7, %v863_v11  ;;  %v821_v19 = vpop.f32.mrb[24].mxu0 }
 0x2b1   : > { %v822_v20 = vadd.f32 %v821_v19, %v2169_v32  ;;  %v823_v9 = vpop.f32.mrb[25].mxu0  ;;  %v914_v38 = vpack.c.bf16 %v894_v17, %v892_v16 }
 0x2b2   : > { %v824_v21 = vadd.f32 %v823_v9, %v2171_v33  ;;  %v825_v12 = vpop.f32.mrb[26].mxu0  ;;  %v915_v37 = vpack.c.bf16 %v895_v10, %v893_v18  ;;  %v1575_v10 = vld [vmem:[%s1982_s22 + $0x10] sm:$0xff] }
 0x2b3   : > { %v864_v25 = vmul.f32 0.1, %v822_v20  ;;  %v826_v13 = vadd.f32 %v825_v12, %v2169_v32  ;;  %v827_v26 = vpop.f32.mrb[27].mxu0 }
 0x2b4   : > { %v865_v24 = vmul.f32 0.1, %v824_v21  ;;  %v828_v27 = vadd.f32 %v827_v26, %v2171_v33  ;;  %1127 = vmatprep.mubr.bf16.mxu1 %v915_v37 }
 0x2b5   : > { %v866_v28 = vmul.f32 0.1, %v826_v13  ;;  %1128 = vmatmul.mubr.bf16.gmra.mrb[20].mxu1 %v914_v38  ;;  %v896_v36 = vmax.f32 %v822_v20, %v864_v25 }
 0x2b6   : > { %v867_v31 = vmul.f32 0.1, %v828_v27  ;;  %v897_v22 = vmax.f32 %v824_v21, %v865_v24  ;;  %v1576_v21 = vld [vmem:[%s1982_s22 + $0x18] sm:$0xff] }
 0x2b7   : > { %v898_v14 = vmax.f32 %v826_v13, %v866_v28 }
 0x2b8   : > { %v899_v15 = vmax.f32 %v828_v27, %v867_v31  ;;  %v831_v34 = vpop.f32.mrb[28].mxu0  ;;  %v1577_v31 = vld [vmem:[%s1982_s22 + $0x20] sm:$0xff] }
 0x2b9   : > { %v832_v35 = vadd.f32 %v831_v34, %v2169_v32  ;;  %v833_v39 = vpop.f32.mrb[29].mxu0  ;;  %v916_v40 = vpack.c.bf16 %v898_v14, %v896_v36  ;;  %v1578_v34 = vld [vmem:[%s1982_s22 + $0x28] sm:$0xff] }
 0x2ba   : > { %v834_v41 = vadd.f32 %v833_v39, %v2171_v33  ;;  %v835_v46 = vpop.f32.mrb[30].mxu0  ;;  %v917_v42 = vpack.c.bf16 %v899_v15, %v897_v22 }
 0x2bb   : > { %v868_v43 = vmul.f32 0.1, %v832_v35  ;;  %v836_v45 = vadd.f32 %v835_v46, %v2169_v32  ;;  %v837_v44 = vpop.f32.mrb[31].mxu0  ;;  %v2208_v32 = vld [vmem:[%s2336_s6] ss:$0 sm:$0xff] }
 0x2bc   : > { %v869_v47 = vmul.f32 0.1, %v834_v41  ;;  %v838_v48 = vadd.f32 %v837_v44, %v2171_v33  ;;  %1135 = vmatprep.mubr.bf16.mxu1 %v917_v42  ;;  %v1579_v44 = vld [vmem:[%s1982_s22 + $0x30] sm:$0xff] }
 0x2bd   : > { %v870_v49 = vmul.f32 0.1, %v836_v45  ;;  %1136 = vmatmul.mubr.bf16.gmra.mrb[24].mxu1 %v916_v40  ;;  %v900_v29 = vmax.f32 %v832_v35, %v868_v43 }
 0x2be   : > { %v871_v50 = vmul.f32 0.1, %v838_v48  ;;  %v901_v52 = vmax.f32 %v834_v41, %v869_v47 }
 0x2bf   : > { %v902_v51 = vmax.f32 %v836_v45, %v870_v49 }
 0x2c0   : > { %v903_v55 = vmax.f32 %v838_v48, %v871_v50 }
 0x2c1   : > { %v918_v56 = vpack.c.bf16 %v902_v51, %v900_v29  ;;  %v1580_v29 = vld [vmem:[%s1982_s22 + $0x38] sm:$0xff] }
 0x2c2   : > { %v919_v57 = vpack.c.bf16 %v903_v55, %v901_v52 }
 0x2c4   : > { %1143 = vmatprep.mubr.bf16.mxu1 %v919_v57 }
 0x2c5   : > { %1144 = vmatmul.mubr.bf16.gmra.mrb[28].mxu1 %v918_v56 }
 0x360   : > { %v1379_v58 = vpop.f32.mrb[0].mxu1 }
 0x361   : > { %v1380_v33 = vpop.f32.mrb[1].mxu1 }
 0x362   : > { %v1381_v59 = vadd.f32 %v1380_v33, %v1379_v58  ;;  %v1382_v54 = vpop.f32.mrb[2].mxu1 }
 0x363   : > { %v1383_v53 = vpop.f32.mrb[3].mxu1 }
 0x364   : > { %v1090_v61 = vadd.f32 %v1381_v59, %v2208_v32  ;;  %v1384_v62 = vadd.f32 %v1383_v53, %v1382_v54  ;;  %v1581_v54 = vld [vmem:[%s1982_s22 + $0x40] sm:$0xff] }
 0x366   : > { %v1154_v1 = vmul.f32 %v2210_v60, %v1090_v61  ;;  %v1093_v2 = vadd.f32 %v1384_v62, %v2208_v32 }
 0x368   : > { %v1170_v30 = vadd.f32 %v1573_v23, %v1154_v1  ;;  %v1155_v3 = vmul.f32 %v2210_v60, %v1093_v2  ;;  %v1385_v4 = vpop.f32.mrb[4].mxu1  ;;  %v1582_v2 = vld [vmem:[%s1982_s22 + $0x48] sm:$0xff] }
 0x369   : > { %v1386_v0 = vpop.f32.mrb[5].mxu1 }
 0x36a   : > { %1186 = vst [vmem:[%s2219_s28] sm:$0xff] %v1170_v30  ;;  %v1171_v63 = vadd.f32 %v1574_v5, %v1155_v3  ;;  %v1387_v6 = vadd.f32 %v1386_v0, %v1385_v4  ;;  %v1388_v7 = vpop.f32.mrb[6].mxu1 }
 0x36b   : > { %v1389_v8 = vpop.f32.mrb[7].mxu1 }
 0x36c   : > { %1187 = vst [vmem:[%s2219_s28 + $0x8] sm:$0xff] %v1171_v63  ;;  %v1098_v11 = vadd.f32 %v1387_v6, %v2208_v32  ;;  %v1390_v16 = vadd.f32 %v1389_v8, %v1388_v7  ;;  %v1583_v7 = vld [vmem:[%s1982_s22 + $0x50] sm:$0xff] }
 0x36e   : > { %v1156_v17 = vmul.f32 %v2210_v60, %v1098_v11  ;;  %v1101_v18 = vadd.f32 %v1390_v16, %v2208_v32 }
 0x370   : > { %v1172_v19 = vadd.f32 %v1575_v10, %v1156_v17  ;;  %v1157_v20 = vmul.f32 %v2210_v60, %v1101_v18  ;;  %v1391_v9 = vpop.f32.mrb[8].mxu1  ;;  %v1584_v18 = vld [vmem:[%s1982_s22 + $0x58] sm:$0xff] }
 0x371   : > { %v1392_v38 = vpop.f32.mrb[9].mxu1 }
 0x372   : > { %1188 = vst [vmem:[%s2219_s28 + $0x10] sm:$0xff] %v1172_v19  ;;  %v1173_v12 = vadd.f32 %v1576_v21, %v1157_v20  ;;  %v1393_v37 = vadd.f32 %v1392_v38, %v1391_v9  ;;  %v1394_v25 = vpop.f32.mrb[10].mxu1 }
 0x373   : > { %v1395_v13 = vpop.f32.mrb[11].mxu1 }
 0x374   : > { %1189 = vst [vmem:[%s2219_s28 + $0x18] sm:$0xff] %v1173_v12  ;;  %v1106_v26 = vadd.f32 %v1393_v37, %v2208_v32  ;;  %v1396_v24 = vadd.f32 %v1395_v13, %v1394_v25  ;;  %v1585_v25 = vld [vmem:[%s1982_s22 + $0x60] sm:$0xff] }
 0x376   : > { %v1158_v27 = vmul.f32 %v2210_v60, %v1106_v26  ;;  %v1109_v28 = vadd.f32 %v1396_v24, %v2208_v32 }
 0x378   : > { %v1174_v36 = vadd.f32 %v1577_v31, %v1158_v27  ;;  %v1159_v14 = vmul.f32 %v2210_v60, %v1109_v28  ;;  %v1397_v22 = vpop.f32.mrb[12].mxu1  ;;  %v1586_v28 = vld [vmem:[%s1982_s22 + $0x68] sm:$0xff] }
 0x379   : > { %v1398_v15 = vpop.f32.mrb[13].mxu1 }
 0x37a   : > { %1190 = vst [vmem:[%s2219_s28 + $0x20] sm:$0xff] %v1174_v36  ;;  %v1175_v35 = vadd.f32 %v1578_v34, %v1159_v14  ;;  %v1399_v39 = vadd.f32 %v1398_v15, %v1397_v22  ;;  %v1400_v40 = vpop.f32.mrb[14].mxu1 }
 0x37b   : > { %v1401_v41 = vpop.f32.mrb[15].mxu1 }
 0x37c   : > { %1191 = vst [vmem:[%s2219_s28 + $0x28] sm:$0xff] %v1175_v35  ;;  %v1114_v46 = vadd.f32 %v1399_v39, %v2208_v32  ;;  %v1402_v42 = vadd.f32 %v1401_v41, %v1400_v40  ;;  %v1587_v40 = vld [vmem:[%s1982_s22 + $0x70] sm:$0xff] }
 0x37e   : > { %v1160_v43 = vmul.f32 %v2210_v60, %v1114_v46  ;;  %v1117_v45 = vadd.f32 %v1402_v42, %v2208_v32  ;;  %v1588_v42 = vld [vmem:[%s1982_s22 + $0x78] sm:$0xff] }
 0x380   : > { %v1176_v47 = vadd.f32 %v1579_v44, %v1160_v43  ;;  %v1161_v48 = vmul.f32 %v2210_v60, %v1117_v45  ;;  %v1403_v49 = vpop.f32.mrb[16].mxu1 }
 0x381   : > { %v1404_v50 = vpop.f32.mrb[17].mxu1 }
 0x382   : > { %1192 = vst [vmem:[%s2219_s28 + $0x30] sm:$0xff] %v1176_v47  ;;  %v1177_v51 = vadd.f32 %v1580_v29, %v1161_v48  ;;  %v1405_v52 = vadd.f32 %v1404_v50, %v1403_v49  ;;  %v1406_v55 = vpop.f32.mrb[18].mxu1 }
 0x383   : > { %v1407_v56 = vpop.f32.mrb[19].mxu1 }
 0x384   : > { %1193 = vst [vmem:[%s2219_s28 + $0x38] sm:$0xff] %v1177_v51  ;;  %v1122_v57 = vadd.f32 %v1405_v52, %v2208_v32  ;;  %v1408_v58 = vadd.f32 %v1407_v56, %v1406_v55 }
 0x386   : > { %v1162_v33 = vmul.f32 %v2210_v60, %v1122_v57  ;;  %v1125_v59 = vadd.f32 %v1408_v58, %v2208_v32 }
 0x388   : > { %v1178_v53 = vadd.f32 %v1581_v54, %v1162_v33  ;;  %v1163_v61 = vmul.f32 %v2210_v60, %v1125_v59  ;;  %v1409_v62 = vpop.f32.mrb[20].mxu1 }
 0x389   : > { %v1410_v1 = vpop.f32.mrb[21].mxu1 }
 0x38a   : > { %1194 = vst [vmem:[%s2219_s28 + $0x40] sm:$0xff] %v1178_v53  ;;  %v1179_v23 = vadd.f32 %v1582_v2, %v1163_v61  ;;  %v1411_v30 = vadd.f32 %v1410_v1, %v1409_v62  ;;  %v1412_v3 = vpop.f32.mrb[22].mxu1 }
 0x38b   : > { %v1413_v4 = vpop.f32.mrb[23].mxu1 }
 0x38c   : > { %1195 = vst [vmem:[%s2219_s28 + $0x48] sm:$0xff] %v1179_v23  ;;  %v1130_v0 = vadd.f32 %v1411_v30, %v2208_v32  ;;  %v1414_v5 = vadd.f32 %v1413_v4, %v1412_v3 }
 0x38e   : > { %v1164_v63 = vmul.f32 %v2210_v60, %v1130_v0  ;;  %v1133_v6 = vadd.f32 %v1414_v5, %v2208_v32 }
 0x390   : > { %v1180_v8 = vadd.f32 %v1583_v7, %v1164_v63  ;;  %v1165_v11 = vmul.f32 %v2210_v60, %v1133_v6  ;;  %v1415_v16 = vpop.f32.mrb[24].mxu1 }
 0x391   : > { %v1416_v17 = vpop.f32.mrb[25].mxu1 }
 0x392   : > { %1196 = vst [vmem:[%s2219_s28 + $0x50] sm:$0xff] %v1180_v8  ;;  %v1181_v10 = vadd.f32 %v1584_v18, %v1165_v11  ;;  %v1417_v19 = vadd.f32 %v1416_v17, %v1415_v16  ;;  %v1418_v20 = vpop.f32.mrb[26].mxu1 }
 0x393   : > { %v1419_v9 = vpop.f32.mrb[27].mxu1 }
 0x394   : > { %1197 = vst [vmem:[%s2219_s28 + $0x58] sm:$0xff] %v1181_v10  ;;  %v1138_v38 = vadd.f32 %v1417_v19, %v2208_v32  ;;  %v1420_v21 = vadd.f32 %v1419_v9, %v1418_v20 }
 0x396   : > { %v1166_v12 = vmul.f32 %v2210_v60, %v1138_v38  ;;  %v1141_v37 = vadd.f32 %v1420_v21, %v2208_v32 }
 0x398   : > { %v1182_v13 = vadd.f32 %v1585_v25, %v1166_v12  ;;  %v1167_v26 = vmul.f32 %v2210_v60, %v1141_v37  ;;  %v1421_v24 = vpop.f32.mrb[28].mxu1 }
 0x399   : > { %v1422_v27 = vpop.f32.mrb[29].mxu1 }
 0x39a   : > { %1198 = vst [vmem:[%s2219_s28 + $0x60] sm:$0xff] %v1182_v13  ;;  %v1183_v31 = vadd.f32 %v1586_v28, %v1167_v26  ;;  %v1423_v36 = vadd.f32 %v1422_v27, %v1421_v24  ;;  %v1424_v14 = vpop.f32.mrb[30].mxu1 }
 0x39b   : > { %v1425_v22 = vpop.f32.mrb[31].mxu1 }
 0x39c   : > { %1199 = vst [vmem:[%s2219_s28 + $0x68] sm:$0xff] %v1183_v31  ;;  %v1146_v15 = vadd.f32 %v1423_v36, %v2208_v32  ;;  %v1426_v34 = vadd.f32 %v1425_v22, %v1424_v14 }
 0x39e   : > { %v1168_v35 = vmul.f32 %v2210_v60, %v1146_v15  ;;  %v1149_v39 = vadd.f32 %v1426_v34, %v2208_v32 }
 0x3a0   : > { %v1184_v41 = vadd.f32 %v1587_v40, %v1168_v35  ;;  %v1169_v46 = vmul.f32 %v2210_v60, %v1149_v39 }
 0x3a2   : > { %1200 = vst [vmem:[%s2219_s28 + $0x70] sm:$0xff] %v1184_v41  ;;  %v1185_v43 = vadd.f32 %v1588_v42, %v1169_v46 }
 0x3a4   : > { %1201 = vst [vmem:[%s2219_s28 + $0x78] sm:$0xff] %v1185_v43 }
 0x3a5   : > { %1688 = shalt.err (!%p1685_p7)
}
 0x3a6   : > { %s1689_s22 = scalar_lea.hbm %s2282_s11, 2048  ;;  %s1693_s28 = scalar_lea.hbm %s2338_s8, 8192 }
 0x3a7   : > { %p1690_p9 = scmp.ne.s32.totalorder %s2282_s11, %s1689_s22  ;;  %p1694_p5 = scmp.lt.u32.totalorder %s2282_s11, %s2338_s8 }
 0x3a8   : > { %p1695_p10 = scmp.lt.u32.totalorder %s1693_s28, %s1689_s22  ;;  %p1697_p2 = scmp.lt.u32.totalorder %s1689_s22, %s2282_s11 }
 0x3a9   : > { %p1691_p12 = pnand %p1690_p9, %p1924_p8 }
 0x3aa   : > { %p1696_p1 = por %p1695_p10, %p1694_p5 }
 0x3ab   : > { %p1692_p0 = pneg %p1691_p12 }
 0x3ac   : > { %p1698_p4 = por %p1697_p2, %p1696_p1 }
 0x3ae   : > { %p1699_p6 = pnand %p1698_p4, %p1692_p0 }
 0x3b0   : > { %1702 = shalt.err (!%p1699_p6)
}
 0x3b1   : > { %s1756_s14 = smov 128   ;;  %s1757_s15 = smov 8  }
 0x3b2   : > { %1437 = dma.vmem_to_hbm [thread:$0]  (%p1924_p8), %s2284_s17, 2048, %s2282_s11, %s1203_s7, %s1756_s14, %s1756_s14, %s1757_s15  }
 0x3b3 PF: > { %p1459_p11 = scmp.ge.s32.totalorder %s1745_s10, 2  ;;  %s1231_s20 = sand.u32 1, %s1733_s29  }
 0x3b4   : > { %p2355_p13 = scmp.ne.s32.totalorder %s2344_s13, 0  ;;  %s1232_s23 = scalar_lea.sflag [#allocation5], %s1231_s20 }
 0x3b6   : > { %p1451_p3 = pnand %p1459_p11, %p2355_p13 }
 0x3b8   : > { %1728 = dma.done.wait (!%p1451_p3), %s1232_s23, 2048  }
 0x3b9   : > { %1730 = vsyncadd (!%p1451_p3), %s1232_s23, 4294965248  ;;  %p23_p7 = scmp.ge.s32.totalorder %s1911_s21, 6   ;;  %s2356_s29 = smov %s1737_s30 }
 0x3ba   : > { %s2357_s30 = smov %s1741_s9  ;;  %s2358_s9 = smov %s1920_s24 }
 0x3bb   : > { %s2359_s10 = smov %s1911_s21  ;;  %25 = sbr.rel (!%p23_p7) target bundleno = 8 (0x8), region = 105 }
 0x3c2   :  { %1237 = vsyncpa [#allocation4], 1 }
 0x3c3   :  { %1239 = vsyncpa [#allocation4 + $0x1], 1 }
 0x3c4   :  { %1240 = vsyncpa [#allocation7], 1 }
 0x3c5   :  { %1241 = vsyncpa [#allocation5], 1 }
 0x3c6   :  { %1243 = vsyncpa [#allocation5 + $0x1], 1 }

// kernel: tpu_custom_call.1
= control target key start
LH: loop header
LB: loop body
LE: loop exit
PB: predicated region body
PF: predicated region fallthrough
CT: control target
= control target key end

     0   :  { %s2330_s0 = inlined_call_operand.hbm [shape: f32[512,128], index: 0, kind: input, shape index: {}]   ;;  %s2331_s1 = inlined_call_operand.vmem [shape: f32[1,128], index: 1, kind: input, shape index: {}]   ;;  %s2332_s2 = inlined_call_operand.vmem [shape: f32[1,128], index: 2, kind: input, shape index: {}]   ;;  %s2333_s3 = inlined_call_operand.hbm [shape: bf16[128,256], index: 3, kind: input, shape index: {}]   ;;  %s2334_s4 = inlined_call_operand.vmem [shape: f32[1,256], index: 4, kind: input, shape index: {}]   ;;  %s2335_s5 = inlined_call_operand.hbm [shape: bf16[256,128], index: 5, kind: input, shape index: {}]   ;;  %s2336_s6 = inlined_call_operand.vmem [shape: f32[1,128], index: 6, kind: input, shape index: {}]   ;;  %s2337_s7 = inlined_call_operand.<no memory space> [shape: f32[1,1], index: 7, kind: input, shape index: {}]   ;;  %s2338_s8 = inlined_call_operand.hbm [shape: f32[512,128], index: 8, kind: output, shape index: {}]  }
   0x1   :  { %13 = sst [smem:[#allocation2]] %s2337_s7 }
   0x2   :  { %14 = vsyncpa [#allocation4], 0 }
   0x3   :  { %16 = vsyncpa [#allocation4 + $0x1], 0 }
   0x4   :  { %17 = vsyncpa [#allocation7], 0 }
   0x5   :  { %18 = vsyncpa [#allocation5], 0 }
   0x6   :  { %20 = vsyncpa [#allocation5 + $0x1], 0  ;;  %s1806_s29 = smov 0   ;;  %s1808_s30 = smov 0  }
   0x7   :  { %s1810_s9 = smov 0   ;;  %s1812_s10 = smov 0  }
   0x8 LB: > { %s1827_s7 = sadd.s32 4294967295, %s1745_s10   ;;  %s1308_s11 = sadd.s32 4294967294, %s1745_s10   ;;  %s1745_s10 = sphi %s1812_s10, %s2359_s10   ;;  %s1741_s9 = sphi %s1810_s9, %s2358_s9   ;;  %s1737_s30 = sphi %s1808_s30, %s2357_s30   ;;  %s1733_s29 = sphi %s1806_s29, %s2356_s29  }
   0x9   : > { %p46_p0 = scmp.ne.s32.totalorder %s1737_s30, %s1733_s29  ;;  %p2339_p1 = scmp.eq.s32.totalorder %s1827_s7, 0 }
   0xa   : > { %p223_p3 = scmp.eq.s32.totalorder %s1308_s11, 3  ;;  %p1309_p5 = scmp.ge.s32.totalorder %s1745_s10, 1 }
   0xb   : > { %p1836_p4 = por %p2339_p1, %p46_p0  ;;  %p230_p7 = scmp.lt.s32.totalorder %s1745_s10, 5 }
   0xc   : > { %p1841_p6 = por %p223_p3, %p46_p0  ;;  %s1747_s15 = smov [#allocation6]  }
   0xd   : > { %s2343_s12 = scalar_select %p1836_p4, 1, 0 }
   0xe   : > { %s2344_s13 = scalar_select %p1841_p6, 1, 0 }
   0xf   : > { %p1846_p8 = pnand %p1309_p5, %p230_p7  ;;  %s248_s16 = sshll.u32 %s1747_s15, 4  ;;  %s249_s16 = int_to_ptr.vmem [resolvable:$true] %s248_s16 }
  0x10   : > { %s1748_s18 = smov [#allocation8]   ;;  %s1589_s22 = scalar_lea.hbm %s2333_s3, 2048 }
  0x11   : > { %s2345_s14 = scalar_select %p1846_p8, 1, 0 }
  0x12   : > { %p1439_p9 = pneg %p1846_p8  ;;  %s264_s19 = sshll.u32 %s1748_s18, 4  ;;  %s1858_s19 = int_to_ptr.vmem [resolvable:$true] %s264_s19 }
  0x13   : > { %p1590_p11 = scmp.ne.s32.totalorder %s2333_s3, %s1589_s22  ;;  %p1596_p3 = scmp.lt.u32.totalorder %s1589_s22, %s2333_s3 }
  0x14   : > { %p1854_p10 = pnand %p1439_p9, %p2339_p1 }
  0x16   : > { %p1591_p12 = pneg %p1854_p10 }
  0x18   : > { %p1592_p13 = pnand %p1591_p12, %p1590_p11 }
  0x1a   : > { %p1593_p0 = pneg %p1592_p13 }
  0x1c   : > { %p1598_p5 = pnand %p1596_p3, %p1593_p0 }
  0x1e   : > { %1601 = shalt.err (!%p1598_p5)
}
  0x1f   : > { %s1602_s27 = scalar_lea.vmem %s249_s16, 2048  ;;  %p1610_p2 = scmp.lt.s32.totalorder %s249_s16, %s249_s16 }
  0x20   : > { %p1603_p7 = scmp.ne.s32.totalorder %s249_s16, %s1602_s27  ;;  %p1611_p6 = scmp.lt.s32.totalorder %s1602_s27, %s1602_s27 }
  0x22   : > { %p1605_p9 = pnand %p1603_p7, %p1591_p12  ;;  %p1612_p4 = por %p1611_p6, %p1610_p2 }
  0x24   : > { %p1606_p1 = pneg %p1605_p9 }
  0x26   : > { %p1613_p8 = pnand %p1612_p4, %p1606_p1 }
  0x28   : > { %1616 = shalt.err (!%p1613_p8)
}
  0x29   : > { %s2342_s28 = smov 128   ;;  %s1750_s11 = smov 8  }
  0x2a   : > { %1442 = dma.hbm_to_vmem [thread:$0]  (!%p1854_p10), %s2333_s3, 2048, %s249_s16, [#allocation7], %s2342_s28, %s2342_s28, %s1750_s11  }
  0x2b   : > { %s1617_s22 = scalar_lea.hbm %s2335_s5, 2048 }
  0x2c   : > { %p1618_p1 = scmp.ne.s32.totalorder %s2335_s5, %s1617_s22  ;;  %p1624_p6 = scmp.lt.u32.totalorder %s1617_s22, %s2335_s5 }
  0x2e   : > { %p1620_p2 = pnand %p1618_p1, %p1591_p12 }
  0x30   : > { %p1621_p4 = pneg %p1620_p2 }
  0x32   : > { %p1626_p8 = pnand %p1624_p6, %p1621_p4 }
  0x34   : > { %1629 = shalt.err (!%p1626_p8)
}
  0x35   : > { %s1630_s16 = scalar_lea.vmem %s1858_s19, 2048  ;;  %p1638_p3 = scmp.lt.s32.totalorder %s1858_s19, %s1858_s19 }
  0x36   : > { %p1631_p11 = scmp.ne.s32.totalorder %s1858_s19, %s1630_s16  ;;  %p1639_p5 = scmp.lt.s32.totalorder %s1630_s16, %s1630_s16 }
  0x38   : > { %p1633_p13 = pnand %p1631_p11, %p1591_p12  ;;  %p1640_p7 = por %p1639_p5, %p1638_p3 }
  0x3a   : > { %p1634_p0 = pneg %p1633_p13 }
  0x3c   : > { %p1641_p9 = pnand %p1640_p7, %p1634_p0 }
  0x3e   : > { %1644 = shalt.err (!%p1641_p9)
}
  0x3f   : > { %s1751_s27 = smov 64   ;;  %s1752_s15 = smov 4  }
  0x40   : > { %1445 = dma.hbm_to_vmem [thread:$0]  (!%p1854_p10), %s2335_s5, 2048, %s1858_s19, [#allocation7], %s1751_s27, %s1751_s27, %s1752_s15  }
  0x41   : > { %s1911_s21 = sadd.s32 1, %s1745_s10   ;;  %s33_s23 = sadd.s32 1, %s1741_s9 }
  0x42   : > { %s30_s22 = ssub.s32 %s1745_s10, %s1911_s21  ;;  %p40_p1 = scmp.ne.s32.totalorder %s1741_s9, %s1737_s30 }
  0x43   : > { %p31_p12 = scmp.eq.s32.totalorder %s30_s22, 0  ;;  %p41_p2 = scmp.eq.s32.totalorder %s1745_s10, 0 }
  0x44   : > { %p2347_p6 = scmp.eq.s32.totalorder %s1827_s7, 3  ;;  %p1456_p11 = scmp.lt.s32.totalorder %s1745_s10, 4 }
  0x45   : > { %s1920_s24 = scalar_select %p31_p12, %s1741_s9, %s33_s23  }
  0x46   : > { %p42_p4 = por %p41_p2, %p40_p1  ;;  %p1924_p8 = por %p2347_p6, %p40_p1 }
  0x47   : > { %s284_s17 = sand.u32 1, %s1741_s9   ;;  %s1361_s19 = sshll.u32 %s1745_s10, 11 }
  0x48   : > { %s1313_s26 = sshll.u32 %s284_s17, 7  ;;  %s1934_s15 = scalar_lea.hbm %s2330_s0, %s1361_s19 }
  0x49   : > { %s288_s18 = scalar_lea.vmem [#allocation3], %s1313_s26  ;;  %p1938_p10 = pnand %p1456_p11, %p42_p4 }
  0x4a   : > { %s295_s20 = sshll.u32 %s288_s18, 4  ;;  %s1942_s23 = scalar_lea.sflag [#allocation4], %s284_s17  ;;  %s1936_s20 = int_to_ptr.vmem [resolvable:$true] %s295_s20 }
  0x4b   : > { %s1645_s28 = scalar_lea.hbm %s1934_s15, 2048  ;;  %p1647_p0 = pneg %p1938_p10 }
  0x4c   : > { %p1646_p13 = scmp.ne.s32.totalorder %s1934_s15, %s1645_s28  ;;  %s1650_s16 = scalar_lea.hbm %s2330_s0, 8192 }
  0x4d   : > { %p1651_p7 = scmp.lt.u32.totalorder %s1934_s15, %s2330_s0  ;;  %p1652_p9 = scmp.lt.u32.totalorder %s1650_s16, %s1645_s28 }
  0x4e   : > { %p1648_p3 = pnand %p1647_p0, %p1646_p13  ;;  %p1654_p1 = scmp.lt.u32.totalorder %s1645_s28, %s1934_s15 }
  0x4f   : > { %p1653_p12 = por %p1652_p9, %p1651_p7 }
  0x50   : > { %p1649_p5 = pneg %p1648_p3 }
  0x51   : > { %p1655_p2 = por %p1654_p1, %p1653_p12 }
  0x53   : > { %p1656_p4 = pnand %p1655_p2, %p1649_p5 }
  0x55   : > { %1659 = shalt.err (!%p1656_p4)
}
  0x56   : > { %s1660_s17 = scalar_lea.vmem %s1936_s20, 2048  ;;  %s1753_s26 = smov [#allocation3]  }
  0x57   : > { %p1661_p6 = scmp.ne.s32.totalorder %s1936_s20, %s1660_s17  ;;  %s1665_s19 = sshll.u32 %s1753_s26, 4  ;;  %s1666_s19 = int_to_ptr.vmem [resolvable:$false] %s1665_s19 }
  0x58   : > { %s1667_s27 = scalar_lea.vmem %s1666_s19, 4096  ;;  %p1668_p3 = scmp.lt.s32.totalorder %s1936_s20, %s1666_s19 }
  0x59   : > { %p1663_p11 = pnand %p1661_p6, %p1647_p0  ;;  %p1669_p7 = scmp.lt.s32.totalorder %s1667_s27, %s1660_s17 }
  0x5b   : > { %p1664_p13 = pneg %p1663_p11  ;;  %p1670_p9 = por %p1669_p7, %p1668_p3 }
  0x5d   : > { %p1671_p12 = pnand %p1670_p9, %p1664_p13 }
  0x5f   : > { %1674 = shalt.err (!%p1671_p12)
}
  0x60   : > { %s2350_s28 = smov 128   ;;  %p2351_p0 = scmp.ne.s32.totalorder %s2345_s14, 0 }
  0x61   : > { %1449 = dma.hbm_to_vmem [thread:$0]  (!%p1938_p10), %s1934_s15, 2048, %s1936_s20, %s1942_s23, %s2350_s28, %s2350_s28, %s1750_s11  }
  0x62   : > { %307 = sbr.rel (%p2351_p0) target bundleno = 947 (0x3b3), region = 52  ;;  %s1976_s16 = sand.u32 (!%p2351_p0), 1, %s1737_s30  }
  0x63   : > { %s1317_s18 = sshll.u32 (!%p2351_p0), %s1976_s16, 7  ;;  %s310_s17 = scalar_lea.sflag (!%p2351_p0), [#allocation4], %s1976_s16 }
  0x64   : > { %s1982_s22 = scalar_lea.vmem (!%p2351_p0), [#allocation3], %s1317_s18  ;;  %p2352_p5 = scmp.ne.s32.totalorder (!%p2351_p0), %s2343_s12, 0 }
  0x69   : > { %1720 = dma.done.wait (%p2352_p5), %s310_s17, 2048  }
  0x6a   : > { %1722 = vsyncadd (%p2352_p5), %s310_s17, 4294965248  ;;  %p2353_p10 = scmp.eq.s32.totalorder %s1827_s7, 0 }
  0x6c   : > { %1724 = dma.done.wait (%p2353_p10), [#allocation7], 4096   ;;  %p2354_p1 = pmov %p2353_p10 }
  0x6d   : > { %v357_v0 = vld [vmem:[%s1982_s22] sm:$0xff]  ;;  %v359_v1 = vld [vmem:[%s1982_s22 + $0x10] sm:$0xff]  ;;  %v358_v2 = vld [vmem:[%s1982_s22 + $0x8] sm:$0xff]  ;;  %s1152_s26 = sld [smem:[#allocation2]]  ;;  %s2219_s28 = scalar_lea.vmem [#allocation9], %s1317_s18 }
  0x6e   : > { %1726 = vsyncadd (%p2354_p1), [#allocation7], 4294963200  ;;  %373 = vadd.xlane.f32.xlu0 %v357_v0  ;;  %377 = vadd.xlane.f32.xlu1 %v359_v1  ;;  %v360_v3 = vld [vmem:[%s1982_s22 + $0x18] sm:$0xff]  ;;  %v361_v4 = vld [vmem:[%s1982_s22 + $0x20] sm:$0xff]  ;;  %s1362_s18 = sshll.u32 %s1827_s7, 11  ;;  %s1216_s17 = sshll.u32 %s2219_s28, 4  ;;  %s2284_s17 = int_to_ptr.vmem [resolvable:$true] %s1216_s17 }
  0x6f   : > { %v362_v5 = vld [vmem:[%s1982_s22 + $0x28] sm:$0xff]  ;;  %v363_v6 = vld [vmem:[%s1982_s22 + $0x30] sm:$0xff]  ;;  %v364_v7 = vld [vmem:[%s1982_s22 + $0x38] sm:$0xff]  ;;  %s2282_s11 = scalar_lea.hbm %s2338_s8, %s1362_s18  ;;  %s1203_s7 = scalar_lea.sflag [#allocation5], %s1976_s16 }
  0x70   : > { %v365_v8 = vld [vmem:[%s1982_s22 + $0x40] sm:$0xff]  ;;  %v2002_v9 = vld [vmem:[%s1982_s22 + $0x48] sm:$0xff]  ;;  %v2005_v10 = vld [vmem:[%s1982_s22 + $0x50] sm:$0xff]  ;;  %s1675_s15 = scalar_lea.vmem %s2284_s17, 2048  ;;  %s1755_s20 = smov [#allocation9]  }
  0x71   : > { %v2008_v11 = vld [vmem:[%s1982_s22 + $0x58] sm:$0xff]  ;;  %v2014_v12 = vld [vmem:[%s1982_s22 + $0x60] sm:$0xff]  ;;  %v2017_v13 = vld [vmem:[%s1982_s22 + $0x68] sm:$0xff]  ;;  %p1676_p2 = scmp.ne.s32.totalorder %s2284_s17, %s1675_s15  ;;  %s1679_s23 = sshll.u32 %s1755_s20, 4  ;;  %s1680_s23 = int_to_ptr.vmem [resolvable:$false] %s1679_s23 }
  0x72   : > { %375 = vadd.xlane.f32.xlu0 %v358_v2  ;;  %379 = vadd.xlane.f32.xlu1 %v360_v3  ;;  %v2022_v14 = vld [vmem:[%s1982_s22 + $0x70] sm:$0xff]  ;;  %v2025_v15 = vld [vmem:[%s1982_s22 + $0x78] sm:$0xff]  ;;  %v1501_v16 = vld [vmem:[#allocation6 + $0x4] ss:$8 sps:$4 sm:$0xff]   ;;  %p1682_p11 = scmp.lt.s32.totalorder %s2284_s17, %s1680_s23 }
  0x73   : > { %v1503_v17 = vld [vmem:[#allocation6] ss:$8 sps:$4 sm:$0xff]   ;;  %727 = vmatprep.subr.bf16.mxu0 %v1501_v16  ;;  %v1504_v58 = vld [vmem:[#allocation6 + $0x14] ss:$8 sps:$4 sm:$0xff]   ;;  %v1506_v62 = vld [vmem:[#allocation6 + $0x10] ss:$8 sps:$4 sm:$0xff]   ;;  %p1677_p4 = pnand %p1676_p2, %p1924_p8 }
  0x74   : > { %728 = vmatpush1.bf16.msra.mxu0 %v1503_v17 }
  0x75   : > { %729 = vmatprep.subr.bf16.mxu0 %v1504_v58  ;;  %p1678_p6 = pneg %p1677_p4 }
  0x76   : > { %381 = vadd.xlane.f32.xlu0 %v361_v4  ;;  %383 = vadd.xlane.f32.xlu1 %v362_v5 }
  0x78   : > { %730 = vmatpush1.bf16.msra.mxu0 %v1506_v62 }
  0x7a   : > { %385 = vadd.xlane.f32.xlu0 %v363_v6  ;;  %387 = vadd.xlane.f32.xlu1 %v364_v7 }
  0x7e   : > { %389 = vadd.xlane.f32.xlu0 %v365_v8  ;;  %391 = vadd.xlane.f32.xlu1 %v2002_v9 }
  0x82   : > { %393 = vadd.xlane.f32.xlu0 %v2005_v10  ;;  %395 = vadd.xlane.f32.xlu1 %v2008_v11 }
  0x86   : > { %397 = vadd.xlane.f32.xlu0 %v2014_v12  ;;  %399 = vadd.xlane.f32.xlu1 %v2017_v13 }
  0x8a   : > { %401 = vadd.xlane.f32.xlu0 %v2022_v14  ;;  %403 = vadd.xlane.f32.xlu1 %v2025_v15 }
  0xfb   : > { %v374_v18 = vpop.xlane.xlu0 %373  ;;  %v378_v19 = vpop.xlane.xlu1 %377 }
  0xfc   : > { %v405_v20 = vmul.f32 0.0078125, %v374_v18  ;;  %v407_v21 = vmul.f32 0.0078125, %v378_v19 }
  0xfe   : > { %v2029_v22 = vsub.f32 %v357_v0, %v405_v20  ;;  %v2031_v23 = vsub.f32 %v359_v1, %v407_v21  ;;  %v1510_v21 = vld [vmem:[#allocation6 + $0x34] ss:$8 sps:$4 sm:$0xff]  }
  0xff   : > { %v376_v24 = vpop.xlane.xlu0 %375  ;;  %v380_v25 = vpop.xlane.xlu1 %379 }
 0x100   : > { %v406_v26 = vmul.f32 0.0078125, %v376_v24  ;;  %v437_v27 = vmul.f32 %v2029_v22, %v2029_v22  ;;  %v408_v28 = vmul.f32 0.0078125, %v380_v25  ;;  %v439_v31 = vmul.f32 %v2031_v23, %v2031_v23 }
 0x102   : > { %v2035_v29 = vsub.f32 %v358_v2, %v406_v26  ;;  %453 = vadd.xlane.f32.xlu0 %v437_v27  ;;  %v2037_v30 = vsub.f32 %v360_v3, %v408_v28  ;;  %v1513_v27 = vld [vmem:[#allocation6 + $0x44] ss:$8 sps:$4 sm:$0xff]   ;;  %v1515_v28 = vld [vmem:[#allocation6 + $0x40] ss:$8 sps:$4 sm:$0xff]  }
 0x103   : > { %v382_v32 = vpop.xlane.xlu0 %381  ;;  %v384_v33 = vpop.xlane.xlu1 %383 }
 0x104   : > { %v409_v34 = vmul.f32 0.0078125, %v382_v32  ;;  %v438_v35 = vmul.f32 %v2035_v29, %v2035_v29  ;;  %v410_v36 = vmul.f32 0.0078125, %v384_v33  ;;  %v440_v39 = vmul.f32 %v2037_v30, %v2037_v30  ;;  %v1519_v32 = vld [vmem:[#allocation6 + $0x64] ss:$8 sps:$4 sm:$0xff]   ;;  %v1521_v33 = vld [vmem:[#allocation6 + $0x60] ss:$8 sps:$4 sm:$0xff]  }
 0x106   : > { %v2043_v37 = vsub.f32 %v361_v4, %v409_v34  ;;  %457 = vadd.xlane.f32.xlu0 %v439_v31  ;;  %455 = vadd.xlane.f32.xlu1 %v438_v35  ;;  %v2045_v38 = vsub.f32 %v362_v5, %v410_v36  ;;  %v1516_v31 = vld [vmem:[#allocation6 + $0x54] ss:$8 sps:$4 sm:$0xff]   ;;  %v1524_v35 = vld [vmem:[#allocation6 + $0x70] ss:$8 sps:$4 sm:$0xff]   ;;  %v1754_v36 = vmov 0  }
 0x107   : > { %v386_v40 = vpop.xlane.xlu0 %385  ;;  %v388_v41 = vpop.xlane.xlu1 %387  ;;  %v1522_v34 = vld [vmem:[#allocation6 + $0x74] ss:$8 sps:$4 sm:$0xff]   ;;  %759 = vmatprep.mubr.bf16.mxu0 %v1754_v36 }
 0x108   : > { %v411_v42 = vmul.f32 0.0078125, %v386_v40  ;;  %v441_v43 = vmul.f32 %v2043_v37, %v2043_v37  ;;  %v412_v44 = vmul.f32 0.0078125, %v388_v41  ;;  %v442_v47 = vmul.f32 %v2045_v38, %v2045_v38  ;;  %v1526_v40 = vld [vmem:[#allocation8] sm:$0xff]   ;;  %v1527_v41 = vld [vmem:[#allocation8 + $0x48] sm:$0xff]  }
 0x10a   : > { %v2051_v45 = vsub.f32 %v363_v6, %v411_v42  ;;  %459 = vadd.xlane.f32.xlu1 %v440_v39  ;;  %461 = vadd.xlane.f32.xlu0 %v441_v43  ;;  %v2053_v46 = vsub.f32 %v364_v7, %v412_v44  ;;  %v1507_v7 = vld [vmem:[#allocation6 + $0x24] ss:$8 sps:$4 sm:$0xff]   ;;  %v1529_v43 = vld [vmem:[#allocation8 + $0x50] sm:$0xff]  }
 0x10b   : > { %v390_v48 = vpop.xlane.xlu0 %389  ;;  %v392_v49 = vpop.xlane.xlu1 %391  ;;  %731 = vmatprep.subr.bf16.mxu0 %v1507_v7  ;;  %v1525_v39 = vld [vmem:[#allocation8 + $0x40] sm:$0xff]   ;;  %v1528_v42 = vld [vmem:[#allocation8 + $0x8] sm:$0xff]   ;;  %v1530_v44 = vld [vmem:[#allocation8 + $0x10] sm:$0xff]  }
 0x10c   : > { %v413_v50 = vmul.f32 0.0078125, %v390_v48  ;;  %v443_v51 = vmul.f32 %v2051_v45, %v2051_v45  ;;  %v414_v52 = vmul.f32 0.0078125, %v392_v49  ;;  %v444_v55 = vmul.f32 %v2053_v46, %v2053_v46  ;;  %1363 = vmatprep.subr.bf16.mxu1 %v1525_v39  ;;  %v1532_v48 = vld [vmem:[#allocation8 + $0x18] sm:$0xff]   ;;  %v1533_v49 = vld [vmem:[#allocation8 + $0x60] sm:$0xff]  }
 0x10d   : > { %1364 = vmatpush3.bf16.msra.mxu1 %v1526_v40 }
 0x10e   : > { %v2059_v53 = vsub.f32 %v365_v8, %v413_v50  ;;  %463 = vadd.xlane.f32.xlu1 %v442_v47  ;;  %465 = vadd.xlane.f32.xlu0 %v443_v51  ;;  %v2062_v54 = vsub.f32 %v2002_v9, %v414_v52  ;;  %v1509_v8 = vld [vmem:[#allocation6 + $0x20] ss:$8 sps:$4 sm:$0xff]   ;;  %v1531_v47 = vld [vmem:[#allocation8 + $0x58] sm:$0xff]  }
 0x10f   : > { %v394_v56 = vpop.xlane.xlu0 %393  ;;  %v396_v57 = vpop.xlane.xlu1 %395  ;;  %732 = vmatpush1.bf16.msra.mxu0 %v1509_v8  ;;  %1365 = vmatprep.subr.bf16.mxu1 %v1527_v41  ;;  %v1534_v50 = vld [vmem:[#allocation8 + $0x20] sm:$0xff]  }
 0x110   : > { %v415_v59 = vmul.f32 0.0078125, %v394_v56  ;;  %v445_v60 = vmul.f32 %v2059_v53, %v2059_v53  ;;  %v416_v61 = vmul.f32 0.0078125, %v396_v57  ;;  %v446_v1 = vmul.f32 %v2062_v54, %v2062_v54  ;;  %733 = vmatprep.subr.bf16.mxu0 %v1510_v21 }
 0x111   : > { %1366 = vmatpush3.bf16.msra.mxu1 %v1528_v42 }
 0x112   : > { %v2069_v63 = vsub.f32 %v2005_v10, %v415_v59  ;;  %467 = vadd.xlane.f32.xlu1 %v444_v55  ;;  %469 = vadd.xlane.f32.xlu0 %v445_v60  ;;  %v2072_v0 = vsub.f32 %v2008_v11, %v416_v61 }
 0x113   : > { %v398_v2 = vpop.xlane.xlu0 %397  ;;  %v400_v3 = vpop.xlane.xlu1 %399  ;;  %1367 = vmatprep.subr.bf16.mxu1 %v1529_v43 }
 0x114   : > { %v417_v4 = vmul.f32 0.0078125, %v398_v2  ;;  %v447_v5 = vmul.f32 %v2069_v63, %v2069_v63  ;;  %v418_v6 = vmul.f32 0.0078125, %v400_v3  ;;  %v448_v11 = vmul.f32 %v2072_v0, %v2072_v0 }
 0x115   : > { %1368 = vmatpush3.bf16.msra.mxu1 %v1530_v44 }
 0x116   : > { %v2079_v9 = vsub.f32 %v2014_v12, %v417_v4  ;;  %471 = vadd.xlane.f32.xlu1 %v446_v1  ;;  %473 = vadd.xlane.f32.xlu0 %v447_v5  ;;  %v2082_v10 = vsub.f32 %v2017_v13, %v418_v6  ;;  %v1512_v12 = vld [vmem:[#allocation6 + $0x30] ss:$8 sps:$4 sm:$0xff]  }
 0x117   : > { %v402_v16 = vpop.xlane.xlu0 %401  ;;  %v404_v17 = vpop.xlane.xlu1 %403  ;;  %734 = vmatpush1.bf16.msra.mxu0 %v1512_v12  ;;  %1369 = vmatprep.subr.bf16.mxu1 %v1531_v47 }
 0x118   : > { %v419_v18 = vmul.f32 0.0078125, %v402_v16  ;;  %v449_v19 = vmul.f32 %v2079_v9, %v2079_v9  ;;  %v420_v20 = vmul.f32 0.0078125, %v404_v17  ;;  %v450_v25 = vmul.f32 %v2082_v10, %v2082_v10  ;;  %735 = vmatprep.subr.bf16.mxu0 %v1513_v27 }
 0x119   : > { %1370 = vmatpush3.bf16.msra.mxu1 %v1532_v48 }
 0x11a   : > { %v2089_v24 = vsub.f32 %v2022_v14, %v419_v18  ;;  %475 = vadd.xlane.f32.xlu1 %v448_v11  ;;  %477 = vadd.xlane.f32.xlu0 %v449_v19  ;;  %v2092_v13 = vsub.f32 %v2025_v15, %v420_v20  ;;  %v1518_v15 = vld [vmem:[#allocation6 + $0x50] ss:$8 sps:$4 sm:$0xff]  }
 0x11b   : > { %736 = vmatpush1.bf16.msra.mxu0 %v1515_v28  ;;  %1371 = vmatprep.subr.bf16.mxu1 %v1533_v49 }
 0x11c   : > { %v451_v26 = vmul.f32 %v2089_v24, %v2089_v24  ;;  %v452_v14 = vmul.f32 %v2092_v13, %v2092_v13  ;;  %737 = vmatprep.subr.bf16.mxu0 %v1516_v31  ;;  %v2105_v31 = vld [vmem:[%s2331_s1] ss:$0 sm:$0xff] }
 0x11d   : > { %1372 = vmatpush3.bf16.msra.mxu1 %v1534_v50 }
 0x11e   : > { %479 = vadd.xlane.f32.xlu1 %v450_v25  ;;  %481 = vadd.xlane.f32.xlu0 %v451_v26 }
 0x11f   : > { %738 = vmatpush1.bf16.msra.mxu0 %v1518_v15 }
 0x120   : > { %739 = vmatprep.subr.bf16.mxu0 %v1519_v32 }
 0x122   : > { %483 = vadd.xlane.f32.xlu1 %v452_v14 }
 0x123   : > { %740 = vmatpush1.bf16.msra.mxu0 %v1521_v33 }
 0x124   : > { %741 = vmatprep.subr.bf16.mxu0 %v1522_v34 }
 0x127   : > { %742 = vmatpush1.bf16.msra.mxu0 %v1524_v35 }
 0x18f   : > { %v454_v51 = vpop.xlane.xlu0 %453 }
 0x190   : > { %v485_v52 = vmax.f32 %v454_v51, 0.0 }
 0x192   : > { %v501_v55 = vmul.f32 0.0078125, %v485_v52 }
 0x193   : > { %v456_v56 = vpop.xlane.xlu1 %455  ;;  %v458_v57 = vpop.xlane.xlu0 %457 }
 0x194   : > { %v517_v58 = vadd.f32 1e-05, %v501_v55  ;;  %v486_v59 = vmax.f32 %v456_v56, 0.0  ;;  %v487_v60 = vmax.f32 %v458_v57, 0.0 }
 0x196   : > { %1541 = vrsqrt.f32 %v517_v58  ;;  %v502_v61 = vmul.f32 0.0078125, %v486_v59  ;;  %v503_v62 = vmul.f32 0.0078125, %v487_v60 }
 0x197   : > { %v460_v1 = vpop.xlane.xlu1 %459  ;;  %v462_v2 = vpop.xlane.xlu0 %461 }
 0x198   : > { %v518_v3 = vadd.f32 1e-05, %v502_v61  ;;  %v519_v4 = vadd.f32 1e-05, %v503_v62  ;;  %v488_v5 = vmax.f32 %v460_v1, 0.0  ;;  %v489_v6 = vmax.f32 %v462_v2, 0.0 }
 0x19a   : > { %1543 = vrsqrt.f32 %v518_v3  ;;  %v504_v7 = vmul.f32 0.0078125, %v488_v5  ;;  %v505_v16 = vmul.f32 0.0078125, %v489_v6 }
 0x19b   : > { %v464_v8 = vpop.xlane.xlu1 %463  ;;  %1545 = vrsqrt.f32 %v519_v4  ;;  %v466_v18 = vpop.xlane.xlu0 %465 }
 0x19c   : > { %v520_v11 = vadd.f32 1e-05, %v504_v7  ;;  %v490_v17 = vmax.f32 %v464_v8, 0.0  ;;  %v521_v12 = vadd.f32 1e-05, %v505_v16  ;;  %v491_v26 = vmax.f32 %v466_v18, 0.0 }
 0x19e   : > { %1547 = vrsqrt.f32 %v520_v11  ;;  %v506_v19 = vmul.f32 0.0078125, %v490_v17  ;;  %v507_v33 = vmul.f32 0.0078125, %v491_v26 }
 0x19f   : > { %v468_v20 = vpop.xlane.xlu1 %467  ;;  %v470_v34 = vpop.xlane.xlu0 %469 }
 0x1a0   : > { %v1542_v21 = vpop.eup %1541  ;;  %v522_v25 = vadd.f32 1e-05, %v506_v19  ;;  %v492_v27 = vmax.f32 %v468_v20, 0.0  ;;  %v523_v47 = vadd.f32 1e-05, %v507_v33  ;;  %v493_v48 = vmax.f32 %v470_v34, 0.0 }
 0x1a1   : > { %v549_v28 = vmul.f32 %v1542_v21, %v2029_v22  ;;  %v2112_v22 = vld [vmem:[%s2332_s2] ss:$0 sm:$0xff] }
 0x1a2   : > { %1549 = vrsqrt.f32 %v522_v25  ;;  %v508_v14 = vmul.f32 0.0078125, %v492_v27  ;;  %v509_v59 = vmul.f32 0.0078125, %v493_v48 }
 0x1a3   : > { %v472_v15 = vpop.xlane.xlu1 %471  ;;  %1551 = vrsqrt.f32 %v521_v12  ;;  %v572_v39 = vmul.f32 %v2105_v31, %v549_v28  ;;  %v474_v60 = vpop.xlane.xlu0 %473 }
 0x1a4   : > { %v1544_v32 = vpop.eup %1543  ;;  %v524_v41 = vadd.f32 1e-05, %v508_v14  ;;  %v494_v42 = vmax.f32 %v472_v15, 0.0  ;;  %v525_v3 = vadd.f32 1e-05, %v509_v59  ;;  %v495_v4 = vmax.f32 %v474_v60, 0.0 }
 0x1a5   : > { %v550_v35 = vmul.f32 %v1544_v32, %v2035_v29  ;;  %v1546_v40 = vpop.eup %1545  ;;  %v595_v49 = vadd.f32 %v2112_v22, %v572_v39 }
 0x1a6   : > { %v551_v29 = vmul.f32 %v1546_v40, %v2031_v23  ;;  %1553 = vrsqrt.f32 %v524_v41  ;;  %v510_v52 = vmul.f32 0.0078125, %v494_v42  ;;  %v511_v18 = vmul.f32 0.0078125, %v495_v4 }
 0x1a7   : > { %v573_v43 = vmul.f32 %v2105_v31, %v550_v35  ;;  %v476_v55 = vpop.xlane.xlu1 %475  ;;  %1555 = vrsqrt.f32 %v523_v47  ;;  %v478_v19 = vpop.xlane.xlu0 %477 }
 0x1a8   : > { %v1548_v44 = vpop.eup %1547  ;;  %v574_v61 = vmul.f32 %v2105_v31, %v551_v29  ;;  %v526_v1 = vadd.f32 1e-05, %v510_v52  ;;  %v496_v2 = vmax.f32 %v476_v55, 0.0  ;;  %v527_v26 = vadd.f32 1e-05, %v511_v18 }
 0x1a9   : > { %v596_v50 = vadd.f32 %v2112_v22, %v573_v43  ;;  %v552_v51 = vmul.f32 %v1548_v44, %v2037_v30  ;;  %v497_v27 = vmax.f32 %v478_v19, 0.0 }
 0x1aa   : > { %v597_v5 = vadd.f32 %v2112_v22, %v574_v61  ;;  %1557 = vrsqrt.f32 %v526_v1  ;;  %v512_v7 = vmul.f32 0.0078125, %v496_v2 }
 0x1ab   : > { %v611_v56 = vpack.c.bf16 %v596_v50, %v595_v49  ;;  %v575_v57 = vmul.f32 %v2105_v31, %v552_v51  ;;  %v480_v8 = vpop.xlane.xlu1 %479  ;;  %1559 = vrsqrt.f32 %v525_v3  ;;  %v513_v39 = vmul.f32 0.0078125, %v497_v27  ;;  %v482_v40 = vpop.xlane.xlu0 %481  ;;  %v1539_v27 = vld [vmem:[#allocation8 + $0x78] sm:$0xff]  }
 0x1ac   : > { %v1550_v58 = vpop.eup %1549  ;;  %v528_v21 = vadd.f32 1e-05, %v512_v7  ;;  %v498_v12 = vmax.f32 %v480_v8, 0.0  ;;  %v499_v48 = vmax.f32 %v482_v40, 0.0 }
 0x1ad   : > { %760 = vmatmul.mubr.bf16.vlgmr.msra.gmra.mrb[0].mxu0 %v611_v56  ;;  %v1552_v62 = vpop.eup %1551  ;;  %v598_v23 = vadd.f32 %v2112_v22, %v575_v57  ;;  %v554_v30 = vmul.f32 %v1550_v58, %v2045_v38  ;;  %v529_v47 = vadd.f32 1e-05, %v513_v39 }
 0x1ae   : > { %769 = vmatprep.mubr.bf16.mxu0 %v1754_v36  ;;  %v553_v6 = vmul.f32 %v1552_v62, %v2043_v37  ;;  %1561 = vrsqrt.f32 %v528_v21  ;;  %v514_v15 = vmul.f32 0.0078125, %v498_v12  ;;  %v515_v56 = vmul.f32 0.0078125, %v499_v48 }
 0x1af   : > { %v612_v11 = vpack.c.bf16 %v598_v23, %v597_v5  ;;  %v577_v16 = vmul.f32 %v2105_v31, %v554_v30  ;;  %v484_v32 = vpop.xlane.xlu1 %483  ;;  %1563 = vrsqrt.f32 %v527_v26  ;;  %v1537_v26 = vld [vmem:[#allocation8 + $0x70] sm:$0xff]  }
 0x1b0   : > { %v1554_v17 = vpop.eup %1553  ;;  %v576_v20 = vmul.f32 %v2105_v31, %v553_v6  ;;  %v530_v42 = vadd.f32 1e-05, %v514_v15  ;;  %v500_v43 = vmax.f32 %v484_v32, 0.0 }
 0x1b1   : > { %v1556_v38 = vpop.eup %1555  ;;  %v600_v37 = vadd.f32 %v2112_v22, %v577_v16  ;;  %v556_v25 = vmul.f32 %v1554_v17, %v2053_v46 }
 0x1b2   : > { %v599_v28 = vadd.f32 %v2112_v22, %v576_v20  ;;  %v555_v14 = vmul.f32 %v1556_v38, %v2051_v45  ;;  %1565 = vrsqrt.f32 %v530_v42  ;;  %v516_v29 = vmul.f32 0.0078125, %v500_v43 }
 0x1b3   : > { %v579_v34 = vmul.f32 %v2105_v31, %v556_v25  ;;  %1567 = vrsqrt.f32 %v529_v47  ;;  %v1535_v25 = vld [vmem:[#allocation8 + $0x68] sm:$0xff]  }
 0x1b4   : > { %v613_v33 = vpack.c.bf16 %v600_v37, %v599_v28  ;;  %v1558_v35 = vpop.eup %1557  ;;  %v578_v41 = vmul.f32 %v2105_v31, %v555_v14  ;;  %v532_v59 = vadd.f32 1e-05, %v516_v29  ;;  %1373 = vmatprep.subr.bf16.mxu1 %v1535_v25  ;;  %v1540_v28 = vld [vmem:[#allocation8 + $0x38] sm:$0xff]  }
 0x1b5   : > { %770 = vmatmul.mubr.bf16.gmra.mrb[4].mxu0 %v612_v11  ;;  %v1560_v46 = vpop.eup %1559  ;;  %v602_v45 = vadd.f32 %v2112_v22, %v579_v34  ;;  %v558_v44 = vmul.f32 %v1558_v35, %v2062_v54 }
 0x1b6   : > { %779 = vmatprep.mubr.bf16.mxu0 %v1754_v36  ;;  %v601_v49 = vadd.f32 %v2112_v22, %v578_v41  ;;  %v557_v50 = vmul.f32 %v1560_v46, %v2059_v53  ;;  %v531_v53 = vadd.f32 1e-05, %v515_v56  ;;  %1569 = vrsqrt.f32 %v532_v59 }
 0x1b7   : > { %v581_v52 = vmul.f32 %v2105_v31, %v558_v44 }
 0x1b8   : > { %v614_v51 = vpack.c.bf16 %v602_v45, %v601_v49  ;;  %v1562_v55 = vpop.eup %1561  ;;  %v580_v57 = vmul.f32 %v2105_v31, %v557_v50  ;;  %1571 = vrsqrt.f32 %v531_v53 }
 0x1b9   : > { %v1564_v58 = vpop.eup %1563  ;;  %v604_v54 = vadd.f32 %v2112_v22, %v581_v52  ;;  %v560_v60 = vmul.f32 %v1562_v55, %v2072_v0 }
 0x1ba   : > { %v603_v61 = vadd.f32 %v2112_v22, %v580_v57  ;;  %v559_v62 = vmul.f32 %v1564_v58, %v2069_v63 }
 0x1bb   : > { %v583_v2 = vmul.f32 %v2105_v31, %v560_v60 }
 0x1bc   : > { %v615_v1 = vpack.c.bf16 %v604_v54, %v603_v61  ;;  %v1566_v23 = vpop.eup %1565  ;;  %v582_v30 = vmul.f32 %v2105_v31, %v559_v62 }
 0x1bd   : > { %780 = vmatmul.mubr.bf16.gmra.mrb[8].mxu0 %v613_v33  ;;  %v1568_v3 = vpop.eup %1567  ;;  %v606_v4 = vadd.f32 %v2112_v22, %v583_v2  ;;  %v562_v0 = vmul.f32 %v1566_v23, %v2082_v10 }
 0x1be   : > { %789 = vmatprep.mubr.bf16.mxu0 %v1754_v36  ;;  %v605_v5 = vadd.f32 %v2112_v22, %v582_v30  ;;  %v561_v63 = vmul.f32 %v1568_v3, %v2079_v9 }
 0x1bf   : > { %v585_v7 = vmul.f32 %v2105_v31, %v562_v0 }
 0x1c0   : > { %v616_v6 = vpack.c.bf16 %v606_v4, %v605_v5  ;;  %v1570_v8 = vpop.eup %1569  ;;  %v584_v11 = vmul.f32 %v2105_v31, %v561_v63 }
 0x1c1   : > { %v608_v17 = vadd.f32 %v2112_v22, %v585_v7  ;;  %v564_v18 = vmul.f32 %v1570_v8, %v2092_v13  ;;  %v1536_v13 = vld [vmem:[#allocation8 + $0x28] sm:$0xff]  }
 0x1c2   : > { %v1572_v16 = vpop.eup %1571  ;;  %v607_v10 = vadd.f32 %v2112_v22, %v584_v11  ;;  %1374 = vmatpush3.bf16.msra.mxu1 %v1536_v13 }
 0x1c3   : > { %v563_v19 = vmul.f32 %v1572_v16, %v2089_v24  ;;  %v587_v9 = vmul.f32 %v2105_v31, %v564_v18  ;;  %v1538_v24 = vld [vmem:[#allocation8 + $0x30] sm:$0xff]   ;;  %1375 = vmatprep.subr.bf16.mxu1 %v1537_v26 }
 0x1c4   : > { %v617_v20 = vpack.c.bf16 %v608_v17, %v607_v10 }
 0x1c5   : > { %790 = vmatmul.mubr.bf16.gmra.mrb[12].mxu0 %v614_v51  ;;  %v586_v38 = vmul.f32 %v2105_v31, %v563_v19  ;;  %v610_v21 = vadd.f32 %v2112_v22, %v587_v9  ;;  %v637_v31 = vlaneseq }
 0x1c6   : > { %799 = vmatprep.mubr.bf16.mxu0 %v1754_v36  ;;  %1376 = vmatpush3.bf16.msra.mxu1 %v1538_v24 }
 0x1c7   : > { %v609_v12 = vadd.f32 %v2112_v22, %v586_v38  ;;  %1377 = vmatprep.subr.bf16.mxu1 %v1539_v27  ;;  %v635_v22 = vld [vmem:[%s2334_s4] sm:$0x3] }
 0x1c9   : > { %v618_v37 = vpack.c.bf16 %v610_v21, %v609_v12 }
 0x1ca   : > { %1378 = vmatpush3.bf16.msra.mxu1 %v1540_v28 }
 0x1cd   : > { %800 = vmatmul.mubr.bf16.gmra.mrb[16].mxu0 %v615_v1 }
 0x1ce   : > { %809 = vmatprep.mubr.bf16.mxu0 %v1754_v36 }
 0x1d5   : > { %810 = vmatmul.mubr.bf16.gmra.mrb[20].mxu0 %v616_v6 }
 0x1d6   : > { %819 = vmatprep.mubr.bf16.mxu0 %v1754_v36 }
 0x1dd   : > { %820 = vmatmul.mubr.bf16.gmra.mrb[24].mxu0 %v617_v20 }
 0x1de   : > { %829 = vmatprep.mubr.bf16.mxu0 %v1754_v36  ;;  %v638_v36 = vshrl.u32 %v637_v31, 7 }
 0x1e0   : > { %v639_v14 = vsub.s32 0, %v638_v36  ;;  %v643_v15 = vsub.s32 1, %v638_v36 }
 0x1e2   : > { %v2169_v32 = vrot.slane %v635_v22, %v639_v14  ;;  %v2171_v33 = vrot.slane %v635_v22, %v643_v15 }
 0x1e5   : > { %830 = vmatmul.mubr.bf16.gmra.mrb[28].mxu0 %v618_v37 }
 0x280   : > { %v761_v34 = vpop.f32.mrb[0].mxu0 }
 0x281   : > { %v762_v35 = vadd.f32 %v761_v34, %v2169_v32  ;;  %v763_v39 = vpop.f32.mrb[1].mxu0 }
 0x282   : > { %v764_v40 = vadd.f32 %v763_v39, %v2171_v33  ;;  %v765_v41 = vpop.f32.mrb[2].mxu0 }
 0x283   : > { %v840_v46 = vmul.f32 0.1, %v762_v35  ;;  %v766_v42 = vadd.f32 %v765_v41, %v2169_v32  ;;  %v767_v43 = vpop.f32.mrb[3].mxu0 }
 0x284   : > { %v841_v45 = vmul.f32 0.1, %v764_v40  ;;  %v768_v44 = vadd.f32 %v767_v43, %v2171_v33 }
 0x285   : > { %v842_v47 = vmul.f32 0.1, %v766_v42  ;;  %v872_v49 = vmax.f32 %v762_v35, %v840_v46 }
 0x286   : > { %v843_v48 = vmul.f32 0.1, %v768_v44  ;;  %v873_v51 = vmax.f32 %v764_v40, %v841_v45 }
 0x287   : > { %v874_v50 = vmax.f32 %v766_v42, %v842_v47 }
 0x288   : > { %v771_v29 = vpop.f32.mrb[4].mxu0  ;;  %v875_v52 = vmax.f32 %v768_v44, %v843_v48 }
 0x289   : > { %v772_v55 = vadd.f32 %v771_v29, %v2169_v32  ;;  %v773_v56 = vpop.f32.mrb[5].mxu0  ;;  %v904_v57 = vpack.c.bf16 %v874_v50, %v872_v49 }
 0x28a   : > { %v774_v58 = vadd.f32 %v773_v56, %v2171_v33  ;;  %v775_v59 = vpop.f32.mrb[6].mxu0  ;;  %v905_v54 = vpack.c.bf16 %v875_v52, %v873_v51 }
 0x28b   : > { %v844_v60 = vmul.f32 0.1, %v772_v55  ;;  %v776_v53 = vadd.f32 %v775_v59, %v2169_v32  ;;  %v777_v61 = vpop.f32.mrb[7].mxu0 }
 0x28c   : > { %v845_v62 = vmul.f32 0.1, %v774_v58  ;;  %v778_v1 = vadd.f32 %v777_v61, %v2171_v33  ;;  %1087 = vmatprep.mubr.bf16.mxu1 %v905_v54 }
 0x28d   : > { %v846_v2 = vmul.f32 0.1, %v776_v53  ;;  %1088 = vmatmul.mubr.bf16.vlgmr.msra.gmra.mrb[0].mxu1 %v904_v57  ;;  %v876_v30 = vmax.f32 %v772_v55, %v844_v60 }
 0x28e   : > { %v847_v23 = vmul.f32 0.1, %v778_v1  ;;  %v877_v4 = vmax.f32 %v774_v58, %v845_v62 }
 0x28f   : > { %v878_v3 = vmax.f32 %v776_v53, %v846_v2 }
 0x290   : > { %v879_v0 = vmax.f32 %v778_v1, %v847_v23  ;;  %v781_v5 = vpop.f32.mrb[8].mxu0 }
 0x291   : > { %v782_v63 = vadd.f32 %v781_v5, %v2169_v32  ;;  %v783_v6 = vpop.f32.mrb[9].mxu0  ;;  %v906_v7 = vpack.c.bf16 %v878_v3, %v876_v30 }
 0x292   : > { %v784_v8 = vadd.f32 %v783_v6, %v2171_v33  ;;  %v785_v11 = vpop.f32.mrb[10].mxu0  ;;  %v907_v16 = vpack.c.bf16 %v879_v0, %v877_v4 }
 0x293   : > { %v848_v17 = vmul.f32 0.1, %v782_v63  ;;  %v786_v18 = vadd.f32 %v785_v11, %v2169_v32  ;;  %v787_v10 = vpop.f32.mrb[11].mxu0 }
 0x294   : > { %v849_v19 = vmul.f32 0.1, %v784_v8  ;;  %v788_v20 = vadd.f32 %v787_v10, %v2171_v33  ;;  %1095 = vmatprep.mubr.bf16.mxu1 %v907_v16 }
 0x295   : > { %v850_v9 = vmul.f32 0.1, %v786_v18  ;;  %1096 = vmatmul.mubr.bf16.gmra.mrb[4].mxu1 %v906_v7  ;;  %v880_v21 = vmax.f32 %v782_v63, %v848_v17 }
 0x296   : > { %v851_v38 = vmul.f32 0.1, %v788_v20  ;;  %v881_v37 = vmax.f32 %v784_v8, %v849_v19 }
 0x297   : > { %v882_v12 = vmax.f32 %v786_v18, %v850_v9 }
 0x298   : > { %v883_v25 = vmax.f32 %v788_v20, %v851_v38  ;;  %v791_v13 = vpop.f32.mrb[12].mxu0 }
 0x299   : > { %v792_v26 = vadd.f32 %v791_v13, %v2169_v32  ;;  %v793_v24 = vpop.f32.mrb[13].mxu0  ;;  %v908_v27 = vpack.c.bf16 %v882_v12, %v880_v21 }
 0x29a   : > { %v794_v28 = vadd.f32 %v793_v24, %v2171_v33  ;;  %v795_v31 = vpop.f32.mrb[14].mxu0  ;;  %v909_v36 = vpack.c.bf16 %v883_v25, %v881_v37 }
 0x29b   : > { %v852_v14 = vmul.f32 0.1, %v792_v26  ;;  %v796_v22 = vadd.f32 %v795_v31, %v2169_v32  ;;  %v797_v15 = vpop.f32.mrb[15].mxu0 }
 0x29c   : > { %v853_v34 = vmul.f32 0.1, %v794_v28  ;;  %v798_v35 = vadd.f32 %v797_v15, %v2171_v33  ;;  %1103 = vmatprep.mubr.bf16.mxu1 %v909_v36 }
 0x29d   : > { %v854_v39 = vmul.f32 0.1, %v796_v22  ;;  %1104 = vmatmul.mubr.bf16.gmra.mrb[8].mxu1 %v908_v27  ;;  %v884_v41 = vmax.f32 %v792_v26, %v852_v14 }
 0x29e   : > { %v855_v40 = vmul.f32 0.1, %v798_v35  ;;  %v885_v42 = vmax.f32 %v794_v28, %v853_v34 }
 0x29f   : > { %v886_v46 = vmax.f32 %v796_v22, %v854_v39 }
 0x2a0   : > { %v887_v43 = vmax.f32 %v798_v35, %v855_v40  ;;  %v801_v45 = vpop.f32.mrb[16].mxu0 }
 0x2a1   : > { %v802_v44 = vadd.f32 %v801_v45, %v2169_v32  ;;  %v803_v47 = vpop.f32.mrb[17].mxu0  ;;  %v910_v48 = vpack.c.bf16 %v886_v46, %v884_v41 }
 0x2a2   : > { %v804_v49 = vadd.f32 %v803_v47, %v2171_v33  ;;  %v805_v50 = vpop.f32.mrb[18].mxu0  ;;  %v911_v29 = vpack.c.bf16 %v887_v43, %v885_v42 }
 0x2a3   : > { %v856_v51 = vmul.f32 0.1, %v802_v44  ;;  %v806_v52 = vadd.f32 %v805_v50, %v2169_v32  ;;  %v807_v55 = vpop.f32.mrb[19].mxu0 }
 0x2a4   : > { %v857_v56 = vmul.f32 0.1, %v804_v49  ;;  %v808_v57 = vadd.f32 %v807_v55, %v2171_v33  ;;  %1111 = vmatprep.mubr.bf16.mxu1 %v911_v29 }
 0x2a5   : > { %v858_v58 = vmul.f32 0.1, %v806_v52  ;;  %1112 = vmatmul.mubr.bf16.gmra.mrb[12].mxu1 %v910_v48  ;;  %v888_v54 = vmax.f32 %v802_v44, %v856_v51 }
 0x2a6   : > { %v859_v59 = vmul.f32 0.1, %v808_v57  ;;  %v889_v53 = vmax.f32 %v804_v49, %v857_v56 }
 0x2a7   : > { %v890_v60 = vmax.f32 %v806_v52, %v858_v58 }
 0x2a8   : > { %v891_v61 = vmax.f32 %v808_v57, %v859_v59  ;;  %v811_v62 = vpop.f32.mrb[20].mxu0 }
 0x2a9   : > { %v812_v1 = vadd.f32 %v811_v62, %v2169_v32  ;;  %v813_v2 = vpop.f32.mrb[21].mxu0  ;;  %v912_v23 = vpack.c.bf16 %v890_v60, %v888_v54  ;;  %v2210_v60 = vstv %s1152_s26  ;;  %s1681_s26 = scalar_lea.vmem %s1680_s23, 4096 }
 0x2aa   : > { %v814_v30 = vadd.f32 %v813_v2, %v2171_v33  ;;  %v815_v3 = vpop.f32.mrb[22].mxu0  ;;  %v913_v4 = vpack.c.bf16 %v891_v61, %v889_v53  ;;  %p1683_p13 = scmp.lt.s32.totalorder %s1681_s26, %s1675_s15 }
 0x2ab   : > { %v860_v0 = vmul.f32 0.1, %v812_v1  ;;  %v816_v5 = vadd.f32 %v815_v3, %v2169_v32  ;;  %v817_v63 = vpop.f32.mrb[23].mxu0 }
 0x2ac   : > { %v861_v6 = vmul.f32 0.1, %v814_v30  ;;  %v818_v7 = vadd.f32 %v817_v63, %v2171_v33  ;;  %1119 = vmatprep.mubr.bf16.mxu1 %v913_v4  ;;  %p1684_p3 = por %p1683_p13, %p1682_p11 }
 0x2ad   : > { %v862_v8 = vmul.f32 0.1, %v816_v5  ;;  %1120 = vmatmul.mubr.bf16.gmra.mrb[16].mxu1 %v912_v23  ;;  %v892_v16 = vmax.f32 %v812_v1, %v860_v0  ;;  %v1573_v23 = vld [vmem:[%s1982_s22] sm:$0xff] }
 0x2ae   : > { %v863_v11 = vmul.f32 0.1, %v818_v7  ;;  %v893_v18 = vmax.f32 %v814_v30, %v861_v6  ;;  %p1685_p7 = pnand %p1684_p3, %p1678_p6 }
 0x2af   : > { %v894_v17 = vmax.f32 %v816_v5, %v862_v8  ;;  %v1574_v5 = vld [vmem:[%s1982_s22 + $0x8] sm:$0xff] }
 0x2b0   : > { %v895_v10 = vmax.f32 %v818_v7, %v863_v11  ;;  %v821_v19 = vpop.f32.mrb[24].mxu0 }
 0x2b1   : > { %v822_v20 = vadd.f32 %v821_v19, %v2169_v32  ;;  %v823_v9 = vpop.f32.mrb[25].mxu0  ;;  %v914_v38 = vpack.c.bf16 %v894_v17, %v892_v16 }
 0x2b2   : > { %v824_v21 = vadd.f32 %v823_v9, %v2171_v33  ;;  %v825_v12 = vpop.f32.mrb[26].mxu0  ;;  %v915_v37 = vpack.c.bf16 %v895_v10, %v893_v18  ;;  %v1575_v10 = vld [vmem:[%s1982_s22 + $0x10] sm:$0xff] }
 0x2b3   : > { %v864_v25 = vmul.f32 0.1, %v822_v20  ;;  %v826_v13 = vadd.f32 %v825_v12, %v2169_v32  ;;  %v827_v26 = vpop.f32.mrb[27].mxu0 }
 0x2b4   : > { %v865_v24 = vmul.f32 0.1, %v824_v21  ;;  %v828_v27 = vadd.f32 %v827_v26, %v2171_v33  ;;  %1127 = vmatprep.mubr.bf16.mxu1 %v915_v37 }
 0x2b5   : > { %v866_v28 = vmul.f32 0.1, %v826_v13  ;;  %1128 = vmatmul.mubr.bf16.gmra.mrb[20].mxu1 %v914_v38  ;;  %v896_v36 = vmax.f32 %v822_v20, %v864_v25 }
 0x2b6   : > { %v867_v31 = vmul.f32 0.1, %v828_v27  ;;  %v897_v22 = vmax.f32 %v824_v21, %v865_v24  ;;  %v1576_v21 = vld [vmem:[%s1982_s22 + $0x18] sm:$0xff] }
 0x2b7   : > { %v898_v14 = vmax.f32 %v826_v13, %v866_v28 }
 0x2b8   : > { %v899_v15 = vmax.f32 %v828_v27, %v867_v31  ;;  %v831_v34 = vpop.f32.mrb[28].mxu0  ;;  %v1577_v31 = vld [vmem:[%s1982_s22 + $0x20] sm:$0xff] }
 0x2b9   : > { %v832_v35 = vadd.f32 %v831_v34, %v2169_v32  ;;  %v833_v39 = vpop.f32.mrb[29].mxu0  ;;  %v916_v40 = vpack.c.bf16 %v898_v14, %v896_v36  ;;  %v1578_v34 = vld [vmem:[%s1982_s22 + $0x28] sm:$0xff] }
 0x2ba   : > { %v834_v41 = vadd.f32 %v833_v39, %v2171_v33  ;;  %v835_v46 = vpop.f32.mrb[30].mxu0  ;;  %v917_v42 = vpack.c.bf16 %v899_v15, %v897_v22 }
 0x2bb   : > { %v868_v43 = vmul.f32 0.1, %v832_v35  ;;  %v836_v45 = vadd.f32 %v835_v46, %v2169_v32  ;;  %v837_v44 = vpop.f32.mrb[31].mxu0  ;;  %v2208_v32 = vld [vmem:[%s2336_s6] ss:$0 sm:$0xff] }
 0x2bc   : > { %v869_v47 = vmul.f32 0.1, %v834_v41  ;;  %v838_v48 = vadd.f32 %v837_v44, %v2171_v33  ;;  %1135 = vmatprep.mubr.bf16.mxu1 %v917_v42  ;;  %v1579_v44 = vld [vmem:[%s1982_s22 + $0x30] sm:$0xff] }
 0x2bd   : > { %v870_v49 = vmul.f32 0.1, %v836_v45  ;;  %1136 = vmatmul.mubr.bf16.gmra.mrb[24].mxu1 %v916_v40  ;;  %v900_v29 = vmax.f32 %v832_v35, %v868_v43 }
 0x2be   : > { %v871_v50 = vmul.f32 0.1, %v838_v48  ;;  %v901_v52 = vmax.f32 %v834_v41, %v869_v47 }
 0x2bf   : > { %v902_v51 = vmax.f32 %v836_v45, %v870_v49 }
 0x2c0   : > { %v903_v55 = vmax.f32 %v838_v48, %v871_v50 }
 0x2c1   : > { %v918_v56 = vpack.c.bf16 %v902_v51, %v900_v29  ;;  %v1580_v29 = vld [vmem:[%s1982_s22 + $0x38] sm:$0xff] }
 0x2c2   : > { %v919_v57 = vpack.c.bf16 %v903_v55, %v901_v52 }
 0x2c4   : > { %1143 = vmatprep.mubr.bf16.mxu1 %v919_v57 }
 0x2c5   : > { %1144 = vmatmul.mubr.bf16.gmra.mrb[28].mxu1 %v918_v56 }
 0x360   : > { %v1379_v58 = vpop.f32.mrb[0].mxu1 }
 0x361   : > { %v1380_v33 = vpop.f32.mrb[1].mxu1 }
 0x362   : > { %v1381_v59 = vadd.f32 %v1380_v33, %v1379_v58  ;;  %v1382_v54 = vpop.f32.mrb[2].mxu1 }
 0x363   : > { %v1383_v53 = vpop.f32.mrb[3].mxu1 }
 0x364   : > { %v1090_v61 = vadd.f32 %v1381_v59, %v2208_v32  ;;  %v1384_v62 = vadd.f32 %v1383_v53, %v1382_v54  ;;  %v1581_v54 = vld [vmem:[%s1982_s22 + $0x40] sm:$0xff] }
 0x366   : > { %v1154_v1 = vmul.f32 %v2210_v60, %v1090_v61  ;;  %v1093_v2 = vadd.f32 %v1384_v62, %v2208_v32 }
 0x368   : > { %v1170_v30 = vadd.f32 %v1573_v23, %v1154_v1  ;;  %v1155_v3 = vmul.f32 %v2210_v60, %v1093_v2  ;;  %v1385_v4 = vpop.f32.mrb[4].mxu1  ;;  %v1582_v2 = vld [vmem:[%s1982_s22 + $0x48] sm:$0xff] }
 0x369   : > { %v1386_v0 = vpop.f32.mrb[5].mxu1 }
 0x36a   : > { %1186 = vst [vmem:[%s2219_s28] sm:$0xff] %v1170_v30  ;;  %v1171_v63 = vadd.f32 %v1574_v5, %v1155_v3  ;;  %v1387_v6 = vadd.f32 %v1386_v0, %v1385_v4  ;;  %v1388_v7 = vpop.f32.mrb[6].mxu1 }
 0x36b   : > { %v1389_v8 = vpop.f32.mrb[7].mxu1 }
 0x36c   : > { %1187 = vst [vmem:[%s2219_s28 + $0x8] sm:$0xff] %v1171_v63  ;;  %v1098_v11 = vadd.f32 %v1387_v6, %v2208_v32  ;;  %v1390_v16 = vadd.f32 %v1389_v8, %v1388_v7  ;;  %v1583_v7 = vld [vmem:[%s1982_s22 + $0x50] sm:$0xff] }
 0x36e   : > { %v1156_v17 = vmul.f32 %v2210_v60, %v1098_v11  ;;  %v1101_v18 = vadd.f32 %v1390_v16, %v2208_v32 }
 0x370   : > { %v1172_v19 = vadd.f32 %v1575_v10, %v1156_v17  ;;  %v1157_v20 = vmul.f32 %v2210_v60, %v1101_v18  ;;  %v1391_v9 = vpop.f32.mrb[8].mxu1  ;;  %v1584_v18 = vld [vmem:[%s1982_s22 + $0x58] sm:$0xff] }
 0x371   : > { %v1392_v38 = vpop.f32.mrb[9].mxu1 }
 0x372   : > { %1188 = vst [vmem:[%s2219_s28 + $0x10] sm:$0xff] %v1172_v19  ;;  %v1173_v12 = vadd.f32 %v1576_v21, %v1157_v20  ;;  %v1393_v37 = vadd.f32 %v1392_v38, %v1391_v9  ;;  %v1394_v25 = vpop.f32.mrb[10].mxu1 }
 0x373   : > { %v1395_v13 = vpop.f32.mrb[11].mxu1 }
 0x374   : > { %1189 = vst [vmem:[%s2219_s28 + $0x18] sm:$0xff] %v1173_v12  ;;  %v1106_v26 = vadd.f32 %v1393_v37, %v2208_v32  ;;  %v1396_v24 = vadd.f32 %v1395_v13, %v1394_v25  ;;  %v1585_v25 = vld [vmem:[%s1982_s22 + $0x60] sm:$0xff] }
 0x376   : > { %v1158_v27 = vmul.f32 %v2210_v60, %v1106_v26  ;;  %v1109_v28 = vadd.f32 %v1396_v24, %v2208_v32 }
 0x378   : > { %v1174_v36 = vadd.f32 %v1577_v31, %v1158_v27  ;;  %v1159_v14 = vmul.f32 %v2210_v60, %v1109_v28  ;;  %v1397_v22 = vpop.f32.mrb[12].mxu1  ;;  %v1586_v28 = vld [vmem:[%s1982_s22 + $0x68] sm:$0xff] }
 0x379   : > { %v1398_v15 = vpop.f32.mrb[13].mxu1 }
 0x37a   : > { %1190 = vst [vmem:[%s2219_s28 + $0x20] sm:$0xff] %v1174_v36  ;;  %v1175_v35 = vadd.f32 %v1578_v34, %v1159_v14  ;;  %v1399_v39 = vadd.f32 %v1398_v15, %v1397_v22  ;;  %v1400_v40 = vpop.f32.mrb[14].mxu1 }
 0x37b   : > { %v1401_v41 = vpop.f32.mrb[15].mxu1 }
 0x37c   : > { %1191 = vst [vmem:[%s2219_s28 + $0x28] sm:$0xff] %v1175_v35  ;;  %v1114_v46 = vadd.f32 %v1399_v39, %v2208_v32  ;;  %v1402_v42 = vadd.f32 %v1401_v41, %v1400_v40  ;;  %v1587_v40 = vld [vmem:[%s1982_s22 + $0x70] sm:$0xff] }
 0x37e   : > { %v1160_v43 = vmul.f32 %v2210_v60, %v1114_v46  ;;  %v1117_v45 = vadd.f32 %v1402_v42, %v2208_v32  ;;  %v1588_v42 = vld [vmem:[%s1982_s22 + $0x78] sm:$0xff] }
 0x380   : > { %v1176_v47 = vadd.f32 %v1579_v44, %v1160_v43  ;;  %v1161_v48 = vmul.f32 %v2210_v60, %v1117_v45  ;;  %v1403_v49 = vpop.f32.mrb[16].mxu1 }
 0x381   : > { %v1404_v50 = vpop.f32.mrb[17].mxu1 }
 0x382   : > { %1192 = vst [vmem:[%s2219_s28 + $0x30] sm:$0xff] %v1176_v47  ;;  %v1177_v51 = vadd.f32 %v1580_v29, %v1161_v48  ;;  %v1405_v52 = vadd.f32 %v1404_v50, %v1403_v49  ;;  %v1406_v55 = vpop.f32.mrb[18].mxu1 }
 0x383   : > { %v1407_v56 = vpop.f32.mrb[19].mxu1 }
 0x384   : > { %1193 = vst [vmem:[%s2219_s28 + $0x38] sm:$0xff] %v1177_v51  ;;  %v1122_v57 = vadd.f32 %v1405_v52, %v2208_v32  ;;  %v1408_v58 = vadd.f32 %v1407_v56, %v1406_v55 }
 0x386   : > { %v1162_v33 = vmul.f32 %v2210_v60, %v1122_v57  ;;  %v1125_v59 = vadd.f32 %v1408_v58, %v2208_v32 }
 0x388   : > { %v1178_v53 = vadd.f32 %v1581_v54, %v1162_v33  ;;  %v1163_v61 = vmul.f32 %v2210_v60, %v1125_v59  ;;  %v1409_v62 = vpop.f32.mrb[20].mxu1 }
 0x389   : > { %v1410_v1 = vpop.f32.mrb[21].mxu1 }
 0x38a   : > { %1194 = vst [vmem:[%s2219_s28 + $0x40] sm:$0xff] %v1178_v53  ;;  %v1179_v23 = vadd.f32 %v1582_v2, %v1163_v61  ;;  %v1411_v30 = vadd.f32 %v1410_v1, %v1409_v62  ;;  %v1412_v3 = vpop.f32.mrb[22].mxu1 }
 0x38b   : > { %v1413_v4 = vpop.f32.mrb[23].mxu1 }
 0x38c   : > { %1195 = vst [vmem:[%s2219_s28 + $0x48] sm:$0xff] %v1179_v23  ;;  %v1130_v0 = vadd.f32 %v1411_v30, %v2208_v32  ;;  %v1414_v5 = vadd.f32 %v1413_v4, %v1412_v3 }
 0x38e   : > { %v1164_v63 = vmul.f32 %v2210_v60, %v1130_v0  ;;  %v1133_v6 = vadd.f32 %v1414_v5, %v2208_v32 }
 0x390   : > { %v1180_v8 = vadd.f32 %v1583_v7, %v1164_v63  ;;  %v1165_v11 = vmul.f32 %v2210_v60, %v1133_v6  ;;  %v1415_v16 = vpop.f32.mrb[24].mxu1 }
 0x391   : > { %v1416_v17 = vpop.f32.mrb[25].mxu1 }
 0x392   : > { %1196 = vst [vmem:[%s2219_s28 + $0x50] sm:$0xff] %v1180_v8  ;;  %v1181_v10 = vadd.f32 %v1584_v18, %v1165_v11  ;;  %v1417_v19 = vadd.f32 %v1416_v17, %v1415_v16  ;;  %v1418_v20 = vpop.f32.mrb[26].mxu1 }
 0x393   : > { %v1419_v9 = vpop.f32.mrb[27].mxu1 }
 0x394   : > { %1197 = vst [vmem:[%s2219_s28 + $0x58] sm:$0xff] %v1181_v10  ;;  %v1138_v38 = vadd.f32 %v1417_v19, %v2208_v32  ;;  %v1420_v21 = vadd.f32 %v1419_v9, %v1418_v20 }
 0x396   : > { %v1166_v12 = vmul.f32 %v2210_v60, %v1138_v38  ;;  %v1141_v37 = vadd.f32 %v1420_v21, %v2208_v32 }
 0x398   : > { %v1182_v13 = vadd.f32 %v1585_v25, %v1166_v12  ;;  %v1167_v26 = vmul.f32 %v2210_v60, %v1141_v37  ;;  %v1421_v24 = vpop.f32.mrb[28].mxu1 }
 0x399   : > { %v1422_v27 = vpop.f32.mrb[29].mxu1 }
 0x39a   : > { %1198 = vst [vmem:[%s2219_s28 + $0x60] sm:$0xff] %v1182_v13  ;;  %v1183_v31 = vadd.f32 %v1586_v28, %v1167_v26  ;;  %v1423_v36 = vadd.f32 %v1422_v27, %v1421_v24  ;;  %v1424_v14 = vpop.f32.mrb[30].mxu1 }
 0x39b   : > { %v1425_v22 = vpop.f32.mrb[31].mxu1 }
 0x39c   : > { %1199 = vst [vmem:[%s2219_s28 + $0x68] sm:$0xff] %v1183_v31  ;;  %v1146_v15 = vadd.f32 %v1423_v36, %v2208_v32  ;;  %v1426_v34 = vadd.f32 %v1425_v22, %v1424_v14 }
 0x39e   : > { %v1168_v35 = vmul.f32 %v2210_v60, %v1146_v15  ;;  %v1149_v39 = vadd.f32 %v1426_v34, %v2208_v32 }
 0x3a0   : > { %v1184_v41 = vadd.f32 %v1587_v40, %v1168_v35  ;;  %v1169_v46 = vmul.f32 %v2210_v60, %v1149_v39 }
 0x3a2   : > { %1200 = vst [vmem:[%s2219_s28 + $0x70] sm:$0xff] %v1184_v41  ;;  %v1185_v43 = vadd.f32 %v1588_v42, %v1169_v46 }
 0x3a4   : > { %1201 = vst [vmem:[%s2219_s28 + $0x78] sm:$0xff] %v1185_v43 }
 0x3a5   : > { %1688 = shalt.err (!%p1685_p7)
}
 0x3a6   : > { %s1689_s22 = scalar_lea.hbm %s2282_s11, 2048  ;;  %s1693_s28 = scalar_lea.hbm %s2338_s8, 8192 }
 0x3a7   : > { %p1690_p9 = scmp.ne.s32.totalorder %s2282_s11, %s1689_s22  ;;  %p1694_p5 = scmp.lt.u32.totalorder %s2282_s11, %s2338_s8 }
 0x3a8   : > { %p1695_p10 = scmp.lt.u32.totalorder %s1693_s28, %s1689_s22  ;;  %p1697_p2 = scmp.lt.u32.totalorder %s1689_s22, %s2282_s11 }
 0x3a9   : > { %p1691_p12 = pnand %p1690_p9, %p1924_p8 }
 0x3aa   : > { %p1696_p1 = por %p1695_p10, %p1694_p5 }
 0x3ab   : > { %p1692_p0 = pneg %p1691_p12 }
 0x3ac   : > { %p1698_p4 = por %p1697_p2, %p1696_p1 }
 0x3ae   : > { %p1699_p6 = pnand %p1698_p4, %p1692_p0 }
 0x3b0   : > { %1702 = shalt.err (!%p1699_p6)
}
 0x3b1   : > { %s1756_s14 = smov 128   ;;  %s1757_s15 = smov 8  }
 0x3b2   : > { %1437 = dma.vmem_to_hbm [thread:$0]  (%p1924_p8), %s2284_s17, 2048, %s2282_s11, %s1203_s7, %s1756_s14, %s1756_s14, %s1757_s15  }
 0x3b3 PF: > { %p1459_p11 = scmp.ge.s32.totalorder %s1745_s10, 2  ;;  %s1231_s20 = sand.u32 1, %s1733_s29  }
 0x3b4   : > { %p2355_p13 = scmp.ne.s32.totalorder %s2344_s13, 0  ;;  %s1232_s23 = scalar_lea.sflag [#allocation5], %s1231_s20 }
 0x3b6   : > { %p1451_p3 = pnand %p1459_p11, %p2355_p13 }
 0x3b8   : > { %1728 = dma.done.wait (!%p1451_p3), %s1232_s23, 2048  }
 0x3b9   : > { %1730 = vsyncadd (!%p1451_p3), %s1232_s23, 4294965248  ;;  %p23_p7 = scmp.ge.s32.totalorder %s1911_s21, 6   ;;  %s2356_s29 = smov %s1737_s30 }
 0x3ba   : > { %s2357_s30 = smov %s1741_s9  ;;  %s2358_s9 = smov %s1920_s24 }
 0x3bb   : > { %s2359_s10 = smov %s1911_s21  ;;  %25 = sbr.rel (!%p23_p7) target bundleno = 8 (0x8), region = 105 }
 0x3c2   :  { %1237 = vsyncpa [#allocation4], 1 }
 0x3c3   :  { %1239 = vsyncpa [#allocation4 + $0x1], 1 }
 0x3c4   :  { %1240 = vsyncpa [#allocation7], 1 }
 0x3c5   :  { %1241 = vsyncpa [#allocation5], 1 }
 0x3c6   :  { %1243 = vsyncpa [#allocation5 + $0x1], 1 }

</bundles_post_ra>
